<compile_context>
chip_gen: v6e
topology: v6e:2x2x1
jax: 0.10.0
libtpu: 0.0.40
codegen_flags: <defaults>
</compile_context>

<pallas_src>
import functools

import jax
import jax.numpy as jnp
from jax.experimental import pallas as pl
from jax.experimental.pallas import tpu as pltpu


def _lstm_head_kernel(x_ref, wih_ref, whh_ref, b_ref,
                      w3_ref, b3_ref, w4_ref, b4_ref,
                      y_ref, *, seq_len, hidden_dim):
    B = y_ref.shape[0]
    H = hidden_dim

    # ---- Hoisted input projection: one (B*T, F) @ (F, 4H) MXU matmul ------
    gx = (jnp.dot(x_ref[...], wih_ref[...], preferred_element_type=jnp.float32)
          + b_ref[...])                          # (B*T, 4H), cols = (i, f, o, g)
    gx = gx.reshape(B, seq_len, 4 * H)           # batch-major rows: b*T + t

    whh = whh_ref[...]                           # (H, 4H), loaded once
    h = jnp.zeros((B, H), jnp.float32)
    c = jnp.zeros((B, H), jnp.float32)

    # ---- Recurrence, fully unrolled at trace time (seq_len is static) -----
    for t in range(seq_len):
        g = gx[:, t, :] + jnp.dot(h, whh, preferred_element_type=jnp.float32)
        s = jax.nn.sigmoid(g[:, 0:3 * H])        # one wide sigmoid over (i,f,o)
        i_g = s[:, 0:H]
        f_g = s[:, H:2 * H]
        o_g = s[:, 2 * H:3 * H]
        g_g = jnp.tanh(g[:, 3 * H:4 * H])
        c = f_g * c + i_g * g_g
        h = o_g * jnp.tanh(c)

    # ---- Head: fc3 + ReLU + fc4 --------------------------------------------
    hid = jnp.maximum(
        jnp.dot(h, w3_ref[...], preferred_element_type=jnp.float32) + b3_ref[...],
        0.0)
    y_ref[...] = (jnp.dot(hid, w4_ref[...], preferred_element_type=jnp.float32)
                  + b4_ref[...]).astype(y_ref.dtype)


def _reorder_gates(w):
    # PyTorch packs LSTM gates along the leading 4H axis as (i, f, g, o);
    # reorder to (i, f, o, g) so one sigmoid covers a contiguous 3H slice.
    i, f, g, o = jnp.split(w, 4, axis=0)
    return jnp.concatenate([i, f, o, g], axis=0)


@functools.partial(jax.jit, static_argnames=("seq_len",))
def lstm_nn_audio_forward(x, params, seq_len):
    """x: (current_batch * seq_len, 578) float32. Returns (y_pred, current_batch)."""
    w_ih, w_hh, b_ih, b_hh, w3, b3, w4, b4 = params
    if x.shape[0] % seq_len != 0:
        raise ValueError(
            f"leading dim {x.shape[0]} is not divisible by seq_len={seq_len} "
            "(PyTorch .view would raise here)")
    current_batch = x.shape[0] // seq_len
    H = w_hh.shape[1]
    C = w4.shape[0]
    n_hid = w3.shape[0]                          # 128

    # Weight prep (trace-time, tiny): gate reorder + transpose to (in, out).
    wih_t = _reorder_gates(w_ih).T               # (F, 4H)
    whh_t = _reorder_gates(w_hh).T               # (H, 4H)
    b = _reorder_gates(b_ih + b_hh).reshape(1, 4 * H)
    w3_t = w3.T                                  # (H, 128)
    b3r = b3.reshape(1, n_hid)
    w4_t = w4.T                                  # (128, C)
    b4r = b4.reshape(1, C)

    full = lambda i: (0, 0)                      # every array: one whole-array block
    kernel = functools.partial(_lstm_head_kernel, seq_len=seq_len, hidden_dim=H)
    y = pl.pallas_call(
        kernel,
        out_shape=jax.ShapeDtypeStruct((current_batch, C), jnp.float32),
        grid_spec=pltpu.PrefetchScalarGridSpec(
            num_scalar_prefetch=0,
            grid=(1,),                           # single invocation; loop is in-kernel
            in_specs=[
                pl.BlockSpec(x.shape, full),
                pl.BlockSpec(wih_t.shape, full),
                pl.BlockSpec(whh_t.shape, full),
                pl.BlockSpec(b.shape, full),
                pl.BlockSpec(w3_t.shape, full),
                pl.BlockSpec(b3r.shape, full),
                pl.BlockSpec(w4_t.shape, full),
                pl.BlockSpec(b4r.shape, full),
            ],
            out_specs=pl.BlockSpec((current_batch, C), full),
        ),
        compiler_params=pltpu.CompilerParams(
            dimension_semantics=("arbitrary",)),
    )(x, wih_t, whh_t, b, w3_t, b3r, w4_t, b4r)
    return y, current_batch


def _reference_forward(x, params, seq_len):
    """Pure-JAX reference (mirrors torch.nn.LSTM + fc3/relu/fc4)."""
    w_ih, w_hh, b_ih, b_hh, w3, b3, w4, b4 = params
    feat = x.shape[1]
    B = x.shape[0] // seq_len
    H = w_hh.shape[1]
    xs = x.reshape(B, seq_len, feat)
    h = jnp.zeros((B, H), jnp.float32)
    c = jnp.zeros((B, H), jnp.float32)
    for t in range(seq_len):
        g = xs[:, t, :] @ w_ih.T + h @ w_hh.T + b_ih + b_hh
        i = jax.nn.sigmoid(g[:, 0 * H:1 * H])
        f = jax.nn.sigmoid(g[:, 1 * H:2 * H])
        gg = jnp.tanh(g[:, 2 * H:3 * H])
        o = jax.nn.sigmoid(g[:, 3 * H:4 * H])
        c = f * c + i * gg
        h = o * jnp.tanh(c)
    out = jnp.maximum(h @ w3.T + b3, 0.0)
    return out @ w4.T + b4, B


def init_params(key, input_size, hidden_dim, num_classes):
    ks = jax.random.split(key, 8)
    s_lstm = 1.0 / jnp.sqrt(hidden_dim)
    s_fc3 = 1.0 / jnp.sqrt(hidden_dim)
    s_fc4 = 1.0 / jnp.sqrt(128.0)
    u = lambda k, shape, s: jax.random.uniform(k, shape, jnp.float32, -s, s)
    return (
        u(ks[0], (4 * hidden_dim, input_size), s_lstm),   # W_ih
        u(ks[1], (4 * hidden_dim, hidden_dim), s_lstm),   # W_hh
        u(ks[2], (4 * hidden_dim,), s_lstm),              # b_ih
        u(ks[3], (4 * hidden_dim,), s_lstm),              # b_hh
        u(ks[4], (128, hidden_dim), s_fc3),               # fc3 W
        u(ks[5], (128,), s_fc3),                          # fc3 b
        u(ks[6], (num_classes, 128), s_fc4),              # fc4 W
        u(ks[7], (num_classes,), s_fc4),                  # fc4 b
    )


if __name__ == "__main__":
    INPUT_SIZE = 578          # fixed by the module (nn.LSTM input_size=578)
    HIDDEN_DIM = 32
    SEQ_LEN = 8
    NUM_CLASSES = 10
    CURRENT_BATCH = 2

    key = jax.random.PRNGKey(0)
    kx, kp = jax.random.split(key)
    # x as PyTorch receives it: (current_batch*seq_len, 578)
    x = jax.random.normal(kx, (CURRENT_BATCH * SEQ_LEN, INPUT_SIZE), jnp.float32)
    params = init_params(kp, INPUT_SIZE, HIDDEN_DIM, NUM_CLASSES)

    y_pred, cur_b = lstm_nn_audio_forward(x, params, SEQ_LEN)
    y_pred = jax.block_until_ready(y_pred)

    y_ref, _ = _reference_forward(x, params, SEQ_LEN)
    assert y_pred.shape == (CURRENT_BATCH, NUM_CLASSES)
    assert int(cur_b) == CURRENT_BATCH
    assert jnp.allclose(y_pred, y_ref, atol=1e-4, rtol=1e-4)

    print("KERNEL_OK")
</pallas_src>

<mosaic_0001>
module attributes {stable_mosaic.version = 11 : i64} {
  func.func @_lstm_head_kernel(%arg0: i32, %arg1: memref<16x578xf32, #tpu.memory_space<vmem>>, %arg2: memref<578x128xf32, #tpu.memory_space<vmem>>, %arg3: memref<32x128xf32, #tpu.memory_space<vmem>>, %arg4: memref<1x128xf32, #tpu.memory_space<vmem>>, %arg5: memref<32x128xf32, #tpu.memory_space<vmem>>, %arg6: memref<1x128xf32, #tpu.memory_space<vmem>>, %arg7: memref<128x10xf32, #tpu.memory_space<vmem>>, %arg8: memref<1x10xf32, #tpu.memory_space<vmem>>, %arg9: memref<2x10xf32, #tpu.memory_space<vmem>>) attributes {dimension_semantics = [#tpu.dimension_semantics<arbitrary>], iteration_bounds = array<i64: 1>, scalar_prefetch = 0 : i64, scratch_operands = 0 : i64, tpu.core_type = #tpu.core_type<tc>, window_params = [{pipeline_mode = #tpu.pipeline_mode<synchronous>, transform_indices = @transform_0, window_bounds = array<i64: 16, 578>}, {pipeline_mode = #tpu.pipeline_mode<synchronous>, transform_indices = @transform_1, window_bounds = array<i64: 578, 128>}, {pipeline_mode = #tpu.pipeline_mode<synchronous>, transform_indices = @transform_2, window_bounds = array<i64: 32, 128>}, {pipeline_mode = #tpu.pipeline_mode<synchronous>, transform_indices = @transform_3, window_bounds = array<i64: 1, 128>}, {pipeline_mode = #tpu.pipeline_mode<synchronous>, transform_indices = @transform_4, window_bounds = array<i64: 32, 128>}, {pipeline_mode = #tpu.pipeline_mode<synchronous>, transform_indices = @transform_5, window_bounds = array<i64: 1, 128>}, {pipeline_mode = #tpu.pipeline_mode<synchronous>, transform_indices = @transform_6, window_bounds = array<i64: 128, 10>}, {pipeline_mode = #tpu.pipeline_mode<synchronous>, transform_indices = @transform_7, window_bounds = array<i64: 1, 10>}, {pipeline_mode = #tpu.pipeline_mode<synchronous>, transform_indices = @transform_8, window_bounds = array<i64: 2, 10>}]} {
    %c0 = arith.constant 0 : index
    %c0_0 = arith.constant 0 : index
    %0 = vector.load %arg1[%c0, %c0_0] : memref<16x578xf32, #tpu.memory_space<vmem>>, vector<16x578xf32>
    %c0_1 = arith.constant 0 : index
    %c0_2 = arith.constant 0 : index
    %1 = vector.load %arg2[%c0_1, %c0_2] : memref<578x128xf32, #tpu.memory_space<vmem>>, vector<578x128xf32>
    %cst = arith.constant dense<0.000000e+00> : vector<16x128xf32>
    %2 = tpu.matmul %0, %1, %cst {dimension_numbers = #tpu.dot_dimension_numbers<[1], [0], [0], [1], [0, 0, 1, 1], [], []>} : vector<16x578xf32>, vector<578x128xf32>, vector<16x128xf32> -> vector<16x128xf32>
    %c0_3 = arith.constant 0 : index
    %c0_4 = arith.constant 0 : index
    %3 = vector.load %arg4[%c0_3, %c0_4] : memref<1x128xf32, #tpu.memory_space<vmem>>, vector<1x128xf32>
    %4 = vector.broadcast %3 : vector<1x128xf32> to vector<16x128xf32>
    %5 = arith.addf %2, %4 : vector<16x128xf32>
    %6 = vector.shape_cast %5 : vector<16x128xf32> to vector<2x8x128xf32>
    %c0_5 = arith.constant 0 : index
    %c0_6 = arith.constant 0 : index
    %7 = vector.load %arg3[%c0_5, %c0_6] : memref<32x128xf32, #tpu.memory_space<vmem>>, vector<32x128xf32>
    %cst_7 = arith.constant 0.000000e+00 : f32
    %8 = vector.broadcast %cst_7 : f32 to vector<2x32xf32>
    %cst_8 = arith.constant 0.000000e+00 : f32
    %9 = vector.broadcast %cst_8 : f32 to vector<2x32xf32>
    %10 = vector.extract_strided_slice %6 {offsets = [0, 0, 0], sizes = [2, 1, 128], strides = [1, 1, 1]} : vector<2x8x128xf32> to vector<2x1x128xf32>
    %11 = vector.shape_cast %10 : vector<2x1x128xf32> to vector<2x128xf32>
    %cst_9 = arith.constant dense<0.000000e+00> : vector<2x128xf32>
    %12 = tpu.matmul %8, %7, %cst_9 {dimension_numbers = #tpu.dot_dimension_numbers<[1], [0], [0], [1], [0, 0, 1, 1], [], []>} : vector<2x32xf32>, vector<32x128xf32>, vector<2x128xf32> -> vector<2x128xf32>
    %13 = arith.addf %11, %12 : vector<2x128xf32>
    %14 = vector.extract_strided_slice %13 {offsets = [0, 0], sizes = [2, 96], strides = [1, 1]} : vector<2x128xf32> to vector<2x96xf32>
    %15 = arith.negf %14 : vector<2x96xf32>
    %16 = math.exp %15 : vector<2x96xf32>
    %cst_10 = arith.constant 1.000000e+00 : f32
    %17 = vector.broadcast %cst_10 : f32 to vector<2x96xf32>
    %18 = arith.addf %17, %16 : vector<2x96xf32>
    %19 = arith.divf %17, %18 : vector<2x96xf32>
    %20 = vector.extract_strided_slice %19 {offsets = [0, 0], sizes = [2, 32], strides = [1, 1]} : vector<2x96xf32> to vector<2x32xf32>
    %21 = vector.extract_strided_slice %19 {offsets = [0, 32], sizes = [2, 32], strides = [1, 1]} : vector<2x96xf32> to vector<2x32xf32>
    %22 = vector.extract_strided_slice %19 {offsets = [0, 64], sizes = [2, 32], strides = [1, 1]} : vector<2x96xf32> to vector<2x32xf32>
    %23 = vector.extract_strided_slice %13 {offsets = [0, 96], sizes = [2, 32], strides = [1, 1]} : vector<2x128xf32> to vector<2x32xf32>
    %24 = math.tanh %23 : vector<2x32xf32>
    %25 = arith.mulf %21, %9 : vector<2x32xf32>
    %26 = arith.mulf %20, %24 : vector<2x32xf32>
    %27 = arith.addf %25, %26 : vector<2x32xf32>
    %28 = math.tanh %27 : vector<2x32xf32>
    %29 = arith.mulf %22, %28 : vector<2x32xf32>
    %30 = vector.extract_strided_slice %6 {offsets = [0, 1, 0], sizes = [2, 1, 128], strides = [1, 1, 1]} : vector<2x8x128xf32> to vector<2x1x128xf32>
    %31 = vector.shape_cast %30 : vector<2x1x128xf32> to vector<2x128xf32>
    %cst_11 = arith.constant dense<0.000000e+00> : vector<2x128xf32>
    %32 = tpu.matmul %29, %7, %cst_11 {dimension_numbers = #tpu.dot_dimension_numbers<[1], [0], [0], [1], [0, 0, 1, 1], [], []>} : vector<2x32xf32>, vector<32x128xf32>, vector<2x128xf32> -> vector<2x128xf32>
    %33 = arith.addf %31, %32 : vector<2x128xf32>
    %34 = vector.extract_strided_slice %33 {offsets = [0, 0], sizes = [2, 96], strides = [1, 1]} : vector<2x128xf32> to vector<2x96xf32>
    %35 = arith.negf %34 : vector<2x96xf32>
    %36 = math.exp %35 : vector<2x96xf32>
    %cst_12 = arith.constant 1.000000e+00 : f32
    %37 = vector.broadcast %cst_12 : f32 to vector<2x96xf32>
    %38 = arith.addf %37, %36 : vector<2x96xf32>
    %39 = arith.divf %37, %38 : vector<2x96xf32>
    %40 = vector.extract_strided_slice %39 {offsets = [0, 0], sizes = [2, 32], strides = [1, 1]} : vector<2x96xf32> to vector<2x32xf32>
    %41 = vector.extract_strided_slice %39 {offsets = [0, 32], sizes = [2, 32], strides = [1, 1]} : vector<2x96xf32> to vector<2x32xf32>
    %42 = vector.extract_strided_slice %39 {offsets = [0, 64], sizes = [2, 32], strides = [1, 1]} : vector<2x96xf32> to vector<2x32xf32>
    %43 = vector.extract_strided_slice %33 {offsets = [0, 96], sizes = [2, 32], strides = [1, 1]} : vector<2x128xf32> to vector<2x32xf32>
    %44 = math.tanh %43 : vector<2x32xf32>
    %45 = arith.mulf %41, %27 : vector<2x32xf32>
    %46 = arith.mulf %40, %44 : vector<2x32xf32>
    %47 = arith.addf %45, %46 : vector<2x32xf32>
    %48 = math.tanh %47 : vector<2x32xf32>
    %49 = arith.mulf %42, %48 : vector<2x32xf32>
    %50 = vector.extract_strided_slice %6 {offsets = [0, 2, 0], sizes = [2, 1, 128], strides = [1, 1, 1]} : vector<2x8x128xf32> to vector<2x1x128xf32>
    %51 = vector.shape_cast %50 : vector<2x1x128xf32> to vector<2x128xf32>
    %cst_13 = arith.constant dense<0.000000e+00> : vector<2x128xf32>
    %52 = tpu.matmul %49, %7, %cst_13 {dimension_numbers = #tpu.dot_dimension_numbers<[1], [0], [0], [1], [0, 0, 1, 1], [], []>} : vector<2x32xf32>, vector<32x128xf32>, vector<2x128xf32> -> vector<2x128xf32>
    %53 = arith.addf %51, %52 : vector<2x128xf32>
    %54 = vector.extract_strided_slice %53 {offsets = [0, 0], sizes = [2, 96], strides = [1, 1]} : vector<2x128xf32> to vector<2x96xf32>
    %55 = arith.negf %54 : vector<2x96xf32>
    %56 = math.exp %55 : vector<2x96xf32>
    %cst_14 = arith.constant 1.000000e+00 : f32
    %57 = vector.broadcast %cst_14 : f32 to vector<2x96xf32>
    %58 = arith.addf %57, %56 : vector<2x96xf32>
    %59 = arith.divf %57, %58 : vector<2x96xf32>
    %60 = vector.extract_strided_slice %59 {offsets = [0, 0], sizes = [2, 32], strides = [1, 1]} : vector<2x96xf32> to vector<2x32xf32>
    %61 = vector.extract_strided_slice %59 {offsets = [0, 32], sizes = [2, 32], strides = [1, 1]} : vector<2x96xf32> to vector<2x32xf32>
    %62 = vector.extract_strided_slice %59 {offsets = [0, 64], sizes = [2, 32], strides = [1, 1]} : vector<2x96xf32> to vector<2x32xf32>
    %63 = vector.extract_strided_slice %53 {offsets = [0, 96], sizes = [2, 32], strides = [1, 1]} : vector<2x128xf32> to vector<2x32xf32>
    %64 = math.tanh %63 : vector<2x32xf32>
    %65 = arith.mulf %61, %47 : vector<2x32xf32>
    %66 = arith.mulf %60, %64 : vector<2x32xf32>
    %67 = arith.addf %65, %66 : vector<2x32xf32>
    %68 = math.tanh %67 : vector<2x32xf32>
    %69 = arith.mulf %62, %68 : vector<2x32xf32>
    %70 = vector.extract_strided_slice %6 {offsets = [0, 3, 0], sizes = [2, 1, 128], strides = [1, 1, 1]} : vector<2x8x128xf32> to vector<2x1x128xf32>
    %71 = vector.shape_cast %70 : vector<2x1x128xf32> to vector<2x128xf32>
    %cst_15 = arith.constant dense<0.000000e+00> : vector<2x128xf32>
    %72 = tpu.matmul %69, %7, %cst_15 {dimension_numbers = #tpu.dot_dimension_numbers<[1], [0], [0], [1], [0, 0, 1, 1], [], []>} : vector<2x32xf32>, vector<32x128xf32>, vector<2x128xf32> -> vector<2x128xf32>
    %73 = arith.addf %71, %72 : vector<2x128xf32>
    %74 = vector.extract_strided_slice %73 {offsets = [0, 0], sizes = [2, 96], strides = [1, 1]} : vector<2x128xf32> to vector<2x96xf32>
    %75 = arith.negf %74 : vector<2x96xf32>
    %76 = math.exp %75 : vector<2x96xf32>
    %cst_16 = arith.constant 1.000000e+00 : f32
    %77 = vector.broadcast %cst_16 : f32 to vector<2x96xf32>
    %78 = arith.addf %77, %76 : vector<2x96xf32>
    %79 = arith.divf %77, %78 : vector<2x96xf32>
    %80 = vector.extract_strided_slice %79 {offsets = [0, 0], sizes = [2, 32], strides = [1, 1]} : vector<2x96xf32> to vector<2x32xf32>
    %81 = vector.extract_strided_slice %79 {offsets = [0, 32], sizes = [2, 32], strides = [1, 1]} : vector<2x96xf32> to vector<2x32xf32>
    %82 = vector.extract_strided_slice %79 {offsets = [0, 64], sizes = [2, 32], strides = [1, 1]} : vector<2x96xf32> to vector<2x32xf32>
    %83 = vector.extract_strided_slice %73 {offsets = [0, 96], sizes = [2, 32], strides = [1, 1]} : vector<2x128xf32> to vector<2x32xf32>
    %84 = math.tanh %83 : vector<2x32xf32>
    %85 = arith.mulf %81, %67 : vector<2x32xf32>
    %86 = arith.mulf %80, %84 : vector<2x32xf32>
    %87 = arith.addf %85, %86 : vector<2x32xf32>
    %88 = math.tanh %87 : vector<2x32xf32>
    %89 = arith.mulf %82, %88 : vector<2x32xf32>
    %90 = vector.extract_strided_slice %6 {offsets = [0, 4, 0], sizes = [2, 1, 128], strides = [1, 1, 1]} : vector<2x8x128xf32> to vector<2x1x128xf32>
    %91 = vector.shape_cast %90 : vector<2x1x128xf32> to vector<2x128xf32>
    %cst_17 = arith.constant dense<0.000000e+00> : vector<2x128xf32>
    %92 = tpu.matmul %89, %7, %cst_17 {dimension_numbers = #tpu.dot_dimension_numbers<[1], [0], [0], [1], [0, 0, 1, 1], [], []>} : vector<2x32xf32>, vector<32x128xf32>, vector<2x128xf32> -> vector<2x128xf32>
    %93 = arith.addf %91, %92 : vector<2x128xf32>
    %94 = vector.extract_strided_slice %93 {offsets = [0, 0], sizes = [2, 96], strides = [1, 1]} : vector<2x128xf32> to vector<2x96xf32>
    %95 = arith.negf %94 : vector<2x96xf32>
    %96 = math.exp %95 : vector<2x96xf32>
    %cst_18 = arith.constant 1.000000e+00 : f32
    %97 = vector.broadcast %cst_18 : f32 to vector<2x96xf32>
    %98 = arith.addf %97, %96 : vector<2x96xf32>
    %99 = arith.divf %97, %98 : vector<2x96xf32>
    %100 = vector.extract_strided_slice %99 {offsets = [0, 0], sizes = [2, 32], strides = [1, 1]} : vector<2x96xf32> to vector<2x32xf32>
    %101 = vector.extract_strided_slice %99 {offsets = [0, 32], sizes = [2, 32], strides = [1, 1]} : vector<2x96xf32> to vector<2x32xf32>
    %102 = vector.extract_strided_slice %99 {offsets = [0, 64], sizes = [2, 32], strides = [1, 1]} : vector<2x96xf32> to vector<2x32xf32>
    %103 = vector.extract_strided_slice %93 {offsets = [0, 96], sizes = [2, 32], strides = [1, 1]} : vector<2x128xf32> to vector<2x32xf32>
    %104 = math.tanh %103 : vector<2x32xf32>
    %105 = arith.mulf %101, %87 : vector<2x32xf32>
    %106 = arith.mulf %100, %104 : vector<2x32xf32>
    %107 = arith.addf %105, %106 : vector<2x32xf32>
    %108 = math.tanh %107 : vector<2x32xf32>
    %109 = arith.mulf %102, %108 : vector<2x32xf32>
    %110 = vector.extract_strided_slice %6 {offsets = [0, 5, 0], sizes = [2, 1, 128], strides = [1, 1, 1]} : vector<2x8x128xf32> to vector<2x1x128xf32>
    %111 = vector.shape_cast %110 : vector<2x1x128xf32> to vector<2x128xf32>
    %cst_19 = arith.constant dense<0.000000e+00> : vector<2x128xf32>
    %112 = tpu.matmul %109, %7, %cst_19 {dimension_numbers = #tpu.dot_dimension_numbers<[1], [0], [0], [1], [0, 0, 1, 1], [], []>} : vector<2x32xf32>, vector<32x128xf32>, vector<2x128xf32> -> vector<2x128xf32>
    %113 = arith.addf %111, %112 : vector<2x128xf32>
    %114 = vector.extract_strided_slice %113 {offsets = [0, 0], sizes = [2, 96], strides = [1, 1]} : vector<2x128xf32> to vector<2x96xf32>
    %115 = arith.negf %114 : vector<2x96xf32>
    %116 = math.exp %115 : vector<2x96xf32>
    %cst_20 = arith.constant 1.000000e+00 : f32
    %117 = vector.broadcast %cst_20 : f32 to vector<2x96xf32>
    %118 = arith.addf %117, %116 : vector<2x96xf32>
    %119 = arith.divf %117, %118 : vector<2x96xf32>
    %120 = vector.extract_strided_slice %119 {offsets = [0, 0], sizes = [2, 32], strides = [1, 1]} : vector<2x96xf32> to vector<2x32xf32>
    %121 = vector.extract_strided_slice %119 {offsets = [0, 32], sizes = [2, 32], strides = [1, 1]} : vector<2x96xf32> to vector<2x32xf32>
    %122 = vector.extract_strided_slice %119 {offsets = [0, 64], sizes = [2, 32], strides = [1, 1]} : vector<2x96xf32> to vector<2x32xf32>
    %123 = vector.extract_strided_slice %113 {offsets = [0, 96], sizes = [2, 32], strides = [1, 1]} : vector<2x128xf32> to vector<2x32xf32>
    %124 = math.tanh %123 : vector<2x32xf32>
    %125 = arith.mulf %121, %107 : vector<2x32xf32>
    %126 = arith.mulf %120, %124 : vector<2x32xf32>
    %127 = arith.addf %125, %126 : vector<2x32xf32>
    %128 = math.tanh %127 : vector<2x32xf32>
    %129 = arith.mulf %122, %128 : vector<2x32xf32>
    %130 = vector.extract_strided_slice %6 {offsets = [0, 6, 0], sizes = [2, 1, 128], strides = [1, 1, 1]} : vector<2x8x128xf32> to vector<2x1x128xf32>
    %131 = vector.shape_cast %130 : vector<2x1x128xf32> to vector<2x128xf32>
    %cst_21 = arith.constant dense<0.000000e+00> : vector<2x128xf32>
    %132 = tpu.matmul %129, %7, %cst_21 {dimension_numbers = #tpu.dot_dimension_numbers<[1], [0], [0], [1], [0, 0, 1, 1], [], []>} : vector<2x32xf32>, vector<32x128xf32>, vector<2x128xf32> -> vector<2x128xf32>
    %133 = arith.addf %131, %132 : vector<2x128xf32>
    %134 = vector.extract_strided_slice %133 {offsets = [0, 0], sizes = [2, 96], strides = [1, 1]} : vector<2x128xf32> to vector<2x96xf32>
    %135 = arith.negf %134 : vector<2x96xf32>
    %136 = math.exp %135 : vector<2x96xf32>
    %cst_22 = arith.constant 1.000000e+00 : f32
    %137 = vector.broadcast %cst_22 : f32 to vector<2x96xf32>
    %138 = arith.addf %137, %136 : vector<2x96xf32>
    %139 = arith.divf %137, %138 : vector<2x96xf32>
    %140 = vector.extract_strided_slice %139 {offsets = [0, 0], sizes = [2, 32], strides = [1, 1]} : vector<2x96xf32> to vector<2x32xf32>
    %141 = vector.extract_strided_slice %139 {offsets = [0, 32], sizes = [2, 32], strides = [1, 1]} : vector<2x96xf32> to vector<2x32xf32>
    %142 = vector.extract_strided_slice %139 {offsets = [0, 64], sizes = [2, 32], strides = [1, 1]} : vector<2x96xf32> to vector<2x32xf32>
    %143 = vector.extract_strided_slice %133 {offsets = [0, 96], sizes = [2, 32], strides = [1, 1]} : vector<2x128xf32> to vector<2x32xf32>
    %144 = math.tanh %143 : vector<2x32xf32>
    %145 = arith.mulf %141, %127 : vector<2x32xf32>
    %146 = arith.mulf %140, %144 : vector<2x32xf32>
    %147 = arith.addf %145, %146 : vector<2x32xf32>
    %148 = math.tanh %147 : vector<2x32xf32>
    %149 = arith.mulf %142, %148 : vector<2x32xf32>
    %150 = vector.extract_strided_slice %6 {offsets = [0, 7, 0], sizes = [2, 1, 128], strides = [1, 1, 1]} : vector<2x8x128xf32> to vector<2x1x128xf32>
    %151 = vector.shape_cast %150 : vector<2x1x128xf32> to vector<2x128xf32>
    %cst_23 = arith.constant dense<0.000000e+00> : vector<2x128xf32>
    %152 = tpu.matmul %149, %7, %cst_23 {dimension_numbers = #tpu.dot_dimension_numbers<[1], [0], [0], [1], [0, 0, 1, 1], [], []>} : vector<2x32xf32>, vector<32x128xf32>, vector<2x128xf32> -> vector<2x128xf32>
    %153 = arith.addf %151, %152 : vector<2x128xf32>
    %154 = vector.extract_strided_slice %153 {offsets = [0, 0], sizes = [2, 96], strides = [1, 1]} : vector<2x128xf32> to vector<2x96xf32>
    %155 = arith.negf %154 : vector<2x96xf32>
    %156 = math.exp %155 : vector<2x96xf32>
    %cst_24 = arith.constant 1.000000e+00 : f32
    %157 = vector.broadcast %cst_24 : f32 to vector<2x96xf32>
    %158 = arith.addf %157, %156 : vector<2x96xf32>
    %159 = arith.divf %157, %158 : vector<2x96xf32>
    %160 = vector.extract_strided_slice %159 {offsets = [0, 0], sizes = [2, 32], strides = [1, 1]} : vector<2x96xf32> to vector<2x32xf32>
    %161 = vector.extract_strided_slice %159 {offsets = [0, 32], sizes = [2, 32], strides = [1, 1]} : vector<2x96xf32> to vector<2x32xf32>
    %162 = vector.extract_strided_slice %159 {offsets = [0, 64], sizes = [2, 32], strides = [1, 1]} : vector<2x96xf32> to vector<2x32xf32>
    %163 = vector.extract_strided_slice %153 {offsets = [0, 96], sizes = [2, 32], strides = [1, 1]} : vector<2x128xf32> to vector<2x32xf32>
    %164 = math.tanh %163 : vector<2x32xf32>
    %165 = arith.mulf %161, %147 : vector<2x32xf32>
    %166 = arith.mulf %160, %164 : vector<2x32xf32>
    %167 = arith.addf %165, %166 : vector<2x32xf32>
    %168 = math.tanh %167 : vector<2x32xf32>
    %169 = arith.mulf %162, %168 : vector<2x32xf32>
    %c0_25 = arith.constant 0 : index
    %c0_26 = arith.constant 0 : index
    %170 = vector.load %arg5[%c0_25, %c0_26] : memref<32x128xf32, #tpu.memory_space<vmem>>, vector<32x128xf32>
    %cst_27 = arith.constant dense<0.000000e+00> : vector<2x128xf32>
    %171 = tpu.matmul %169, %170, %cst_27 {dimension_numbers = #tpu.dot_dimension_numbers<[1], [0], [0], [1], [0, 0, 1, 1], [], []>} : vector<2x32xf32>, vector<32x128xf32>, vector<2x128xf32> -> vector<2x128xf32>
    %c0_28 = arith.constant 0 : index
    %c0_29 = arith.constant 0 : index
    %172 = vector.load %arg6[%c0_28, %c0_29] : memref<1x128xf32, #tpu.memory_space<vmem>>, vector<1x128xf32>
    %173 = vector.broadcast %172 : vector<1x128xf32> to vector<2x128xf32>
    %174 = arith.addf %171, %173 : vector<2x128xf32>
    %cst_30 = arith.constant 0.000000e+00 : f32
    %175 = vector.broadcast %cst_30 : f32 to vector<2x128xf32>
    %176 = arith.maximumf %174, %175 : vector<2x128xf32>
    %c0_31 = arith.constant 0 : index
    %c0_32 = arith.constant 0 : index
    %177 = vector.load %arg7[%c0_31, %c0_32] : memref<128x10xf32, #tpu.memory_space<vmem>>, vector<128x10xf32>
    %cst_33 = arith.constant dense<0.000000e+00> : vector<2x10xf32>
    %178 = tpu.matmul %176, %177, %cst_33 {dimension_numbers = #tpu.dot_dimension_numbers<[1], [0], [0], [1], [0, 0, 1, 1], [], []>} : vector<2x128xf32>, vector<128x10xf32>, vector<2x10xf32> -> vector<2x10xf32>
    %c0_34 = arith.constant 0 : index
    %c0_35 = arith.constant 0 : index
    %179 = vector.load %arg8[%c0_34, %c0_35] : memref<1x10xf32, #tpu.memory_space<vmem>>, vector<1x10xf32>
    %180 = vector.broadcast %179 : vector<1x10xf32> to vector<2x10xf32>
    %181 = arith.addf %178, %180 : vector<2x10xf32>
    %c0_36 = arith.constant 0 : index
    %c0_37 = arith.constant 0 : index
    %182 = vector.load %arg9[%c0_36, %c0_37] : memref<2x10xf32, #tpu.memory_space<vmem>>, vector<2x10xf32>
    tpu.vector_store %arg9[%c0_36, %c0_37], %181 {strides = array<i32>} : memref<2x10xf32, #tpu.memory_space<vmem>>, vector<2x10xf32>,
    return
  }
  func.func @transform_0(%arg0: i32) -> (i32, i32) {
    %c0_i32 = arith.constant 0 : i32
    %c0_i32_0 = arith.constant 0 : i32
    %c0_i32_1 = arith.constant 0 : i32
    return %c0_i32, %c0_i32_0 : i32, i32
  }
  func.func @transform_1(%arg0: i32) -> (i32, i32) {
    %c0_i32 = arith.constant 0 : i32
    %c0_i32_0 = arith.constant 0 : i32
    %c0_i32_1 = arith.constant 0 : i32
    return %c0_i32, %c0_i32_0 : i32, i32
  }
  func.func @transform_2(%arg0: i32) -> (i32, i32) {
    %c0_i32 = arith.constant 0 : i32
    %c0_i32_0 = arith.constant 0 : i32
    %c0_i32_1 = arith.constant 0 : i32
    return %c0_i32, %c0_i32_0 : i32, i32
  }
  func.func @transform_3(%arg0: i32) -> (i32, i32) {
    %c0_i32 = arith.constant 0 : i32
    %c0_i32_0 = arith.constant 0 : i32
    %c0_i32_1 = arith.constant 0 : i32
    return %c0_i32, %c0_i32_0 : i32, i32
  }
  func.func @transform_4(%arg0: i32) -> (i32, i32) {
    %c0_i32 = arith.constant 0 : i32
    %c0_i32_0 = arith.constant 0 : i32
    %c0_i32_1 = arith.constant 0 : i32
    return %c0_i32, %c0_i32_0 : i32, i32
  }
  func.func @transform_5(%arg0: i32) -> (i32, i32) {
    %c0_i32 = arith.constant 0 : i32
    %c0_i32_0 = arith.constant 0 : i32
    %c0_i32_1 = arith.constant 0 : i32
    return %c0_i32, %c0_i32_0 : i32, i32
  }
  func.func @transform_6(%arg0: i32) -> (i32, i32) {
    %c0_i32 = arith.constant 0 : i32
    %c0_i32_0 = arith.constant 0 : i32
    %c0_i32_1 = arith.constant 0 : i32
    return %c0_i32, %c0_i32_0 : i32, i32
  }
  func.func @transform_7(%arg0: i32) -> (i32, i32) {
    %c0_i32 = arith.constant 0 : i32
    %c0_i32_0 = arith.constant 0 : i32
    %c0_i32_1 = arith.constant 0 : i32
    return %c0_i32, %c0_i32_0 : i32, i32
  }
  func.func @transform_8(%arg0: i32) -> (i32, i32) {
    %c0_i32 = arith.constant 0 : i32
    %c0_i32_0 = arith.constant 0 : i32
    %c0_i32_1 = arith.constant 0 : i32
    return %c0_i32, %c0_i32_0 : i32, i32
  }
}

</mosaic_0001>

<bundles_post_ra>
// kernel: lstm_nn_audio_forward.1
= control target key start
LH: loop header
LB: loop body
LE: loop exit
PB: predicated region body
PF: predicated region fallthrough
CT: control target
= control target key end

     0   :  { %s2745_s0 = inlined_call_operand.vmem [shape: f32[16,578], index: 0, kind: input, shape index: {}]   ;;  %s2746_s1 = inlined_call_operand.vmem [shape: f32[578,128], index: 1, kind: input, shape index: {}]   ;;  %s2747_s2 = inlined_call_operand.vmem [shape: f32[32,128], index: 2, kind: input, shape index: {}]   ;;  %s2748_s3 = inlined_call_operand.vmem [shape: f32[1,128], index: 3, kind: input, shape index: {}]   ;;  %s2749_s4 = inlined_call_operand.vmem [shape: f32[32,128], index: 4, kind: input, shape index: {}]   ;;  %s2750_s5 = inlined_call_operand.vmem [shape: f32[1,128], index: 5, kind: input, shape index: {}]   ;;  %s2751_s6 = inlined_call_operand.vmem [shape: f32[128,10], index: 6, kind: input, shape index: {}]   ;;  %s2752_s7 = inlined_call_operand.vmem [shape: f32[1,10], index: 7, kind: input, shape index: {}]   ;;  %s2753_s8 = inlined_call_operand.hbm [shape: f32[2,10], index: 8, kind: output, shape index: {}]  }
   0x1   :  { %v71_v0 = vld [vmem:[%s2746_s1 + $0xf8] sm:$0xff]  ;;  %v70_v4 = vld [vmem:[%s2746_s1 + $0xf0] sm:$0xff]  ;;  %v69_v8 = vld [vmem:[%s2746_s1 + $0xe8] sm:$0xff] }
   0x2   :  { %v103_v1 = vld [vmem:[%s2746_s1 + $0x1f8] sm:$0xff]  ;;  %1696 = vmatprep.subr.mxu0 %v71_v0  ;;  %v102_v5 = vld [vmem:[%s2746_s1 + $0x1f0] sm:$0xff]  ;;  %v101_v9 = vld [vmem:[%s2746_s1 + $0x1e8] sm:$0xff] }
   0x3   :  { %v55_v2 = vld [vmem:[%s2746_s1 + $0x78] sm:$0xff]  ;;  %1734 = vmatprep.subr.mxu1 %v103_v1  ;;  %v54_v6 = vld [vmem:[%s2746_s1 + $0x70] sm:$0xff]  ;;  %v53_v10 = vld [vmem:[%s2746_s1 + $0x68] sm:$0xff] }
   0x4   :  { %v87_v3 = vld [vmem:[%s2746_s1 + $0x178] sm:$0xff]  ;;  %1697 = vmatpush3.msra.mxu0 %v55_v2  ;;  %v86_v7 = vld [vmem:[%s2746_s1 + $0x170] sm:$0xff]  ;;  %v85_v11 = vld [vmem:[%s2746_s1 + $0x168] sm:$0xff] }
   0x5   :  { %1735 = vmatpush3.msra.mxu1 %v87_v3  ;;  %1698 = vmatprep.subr.mxu0 %v70_v4  ;;  %v68_v12 = vld [vmem:[%s2746_s1 + $0xe0] sm:$0xff]  ;;  %v67_v16 = vld [vmem:[%s2746_s1 + $0xd8] sm:$0xff]  ;;  %v66_v20 = vld [vmem:[%s2746_s1 + $0xd0] sm:$0xff] }
   0x6   :  { %1736 = vmatprep.subr.mxu1 %v102_v5  ;;  %1699 = vmatpush3.msra.mxu0 %v54_v6  ;;  %v100_v13 = vld [vmem:[%s2746_s1 + $0x1e0] sm:$0xff]  ;;  %v99_v17 = vld [vmem:[%s2746_s1 + $0x1d8] sm:$0xff]  ;;  %v98_v21 = vld [vmem:[%s2746_s1 + $0x1d0] sm:$0xff] }
   0x7   :  { %1737 = vmatpush3.msra.mxu1 %v86_v7  ;;  %1700 = vmatprep.subr.mxu0 %v69_v8  ;;  %v52_v14 = vld [vmem:[%s2746_s1 + $0x60] sm:$0xff]  ;;  %v51_v18 = vld [vmem:[%s2746_s1 + $0x58] sm:$0xff]  ;;  %v50_v22 = vld [vmem:[%s2746_s1 + $0x50] sm:$0xff] }
   0x8   :  { %1738 = vmatprep.subr.mxu1 %v101_v9  ;;  %v84_v15 = vld [vmem:[%s2746_s1 + $0x160] sm:$0xff]  ;;  %1701 = vmatpush3.msra.mxu0 %v53_v10  ;;  %v83_v19 = vld [vmem:[%s2746_s1 + $0x158] sm:$0xff]  ;;  %v82_v23 = vld [vmem:[%s2746_s1 + $0x150] sm:$0xff] }
   0x9   :  { %1739 = vmatpush3.msra.mxu1 %v85_v11  ;;  %1702 = vmatprep.subr.mxu0 %v68_v12  ;;  %v65_v24 = vld [vmem:[%s2746_s1 + $0xc8] sm:$0xff]  ;;  %v64_v28 = vld [vmem:[%s2746_s1 + $0xc0] sm:$0xff]  ;;  %v63_v32 = vld [vmem:[%s2746_s1 + $0xb8] sm:$0xff] }
   0xa   :  { %1740 = vmatprep.subr.mxu1 %v100_v13  ;;  %1703 = vmatpush3.msra.mxu0 %v52_v14  ;;  %v97_v25 = vld [vmem:[%s2746_s1 + $0x1c8] sm:$0xff]  ;;  %v96_v29 = vld [vmem:[%s2746_s1 + $0x1c0] sm:$0xff]  ;;  %v95_v33 = vld [vmem:[%s2746_s1 + $0x1b8] sm:$0xff] }
   0xb   :  { %1741 = vmatpush3.msra.mxu1 %v84_v15  ;;  %1704 = vmatprep.subr.mxu0 %v67_v16  ;;  %v49_v26 = vld [vmem:[%s2746_s1 + $0x48] sm:$0xff]  ;;  %v48_v30 = vld [vmem:[%s2746_s1 + $0x40] sm:$0xff]  ;;  %v47_v34 = vld [vmem:[%s2746_s1 + $0x38] sm:$0xff] }
   0xc   :  { %1742 = vmatprep.subr.mxu1 %v99_v17  ;;  %1705 = vmatpush3.msra.mxu0 %v51_v18  ;;  %v81_v27 = vld [vmem:[%s2746_s1 + $0x148] sm:$0xff]  ;;  %v80_v31 = vld [vmem:[%s2746_s1 + $0x140] sm:$0xff]  ;;  %v79_v35 = vld [vmem:[%s2746_s1 + $0x138] sm:$0xff] }
   0xd   :  { %1743 = vmatpush3.msra.mxu1 %v83_v19  ;;  %1706 = vmatprep.subr.mxu0 %v66_v20  ;;  %v62_v36 = vld [vmem:[%s2746_s1 + $0xb0] sm:$0xff]  ;;  %v61_v40 = vld [vmem:[%s2746_s1 + $0xa8] sm:$0xff]  ;;  %v60_v44 = vld [vmem:[%s2746_s1 + $0xa0] sm:$0xff] }
   0xe   :  { %1744 = vmatprep.subr.mxu1 %v98_v21  ;;  %1707 = vmatpush3.msra.mxu0 %v50_v22  ;;  %v94_v37 = vld [vmem:[%s2746_s1 + $0x1b0] sm:$0xff]  ;;  %v93_v41 = vld [vmem:[%s2746_s1 + $0x1a8] sm:$0xff]  ;;  %v92_v45 = vld [vmem:[%s2746_s1 + $0x1a0] sm:$0xff] }
   0xf   :  { %1745 = vmatpush3.msra.mxu1 %v82_v23  ;;  %1708 = vmatprep.subr.mxu0 %v65_v24  ;;  %v46_v38 = vld [vmem:[%s2746_s1 + $0x30] sm:$0xff]  ;;  %v45_v42 = vld [vmem:[%s2746_s1 + $0x28] sm:$0xff]  ;;  %v44_v46 = vld [vmem:[%s2746_s1 + $0x20] sm:$0xff] }
  0x10   :  { %1746 = vmatprep.subr.mxu1 %v97_v25  ;;  %1709 = vmatpush3.msra.mxu0 %v49_v26  ;;  %v78_v39 = vld [vmem:[%s2746_s1 + $0x130] sm:$0xff]  ;;  %v77_v43 = vld [vmem:[%s2746_s1 + $0x128] sm:$0xff]  ;;  %v76_v47 = vld [vmem:[%s2746_s1 + $0x120] sm:$0xff] }
  0x11   :  { %1747 = vmatpush3.msra.mxu1 %v81_v27  ;;  %1710 = vmatprep.subr.mxu0 %v64_v28  ;;  %v59_v48 = vld [vmem:[%s2746_s1 + $0x98] sm:$0xff]  ;;  %v58_v52 = vld [vmem:[%s2746_s1 + $0x90] sm:$0xff]  ;;  %v57_v56 = vld [vmem:[%s2746_s1 + $0x88] sm:$0xff] }
  0x12   :  { %1748 = vmatprep.subr.mxu1 %v96_v29  ;;  %1711 = vmatpush3.msra.mxu0 %v48_v30  ;;  %v91_v49 = vld [vmem:[%s2746_s1 + $0x198] sm:$0xff]  ;;  %v90_v53 = vld [vmem:[%s2746_s1 + $0x190] sm:$0xff]  ;;  %v89_v57 = vld [vmem:[%s2746_s1 + $0x188] sm:$0xff] }
  0x13   :  { %1749 = vmatpush3.msra.mxu1 %v80_v31  ;;  %1712 = vmatprep.subr.mxu0 %v63_v32  ;;  %v43_v50 = vld [vmem:[%s2746_s1 + $0x18] sm:$0xff]  ;;  %v42_v54 = vld [vmem:[%s2746_s1 + $0x10] sm:$0xff]  ;;  %v41_v58 = vld [vmem:[%s2746_s1 + $0x8] sm:$0xff] }
  0x14   :  { %1750 = vmatprep.subr.mxu1 %v95_v33  ;;  %1713 = vmatpush3.msra.mxu0 %v47_v34  ;;  %v75_v51 = vld [vmem:[%s2746_s1 + $0x118] sm:$0xff]  ;;  %v74_v55 = vld [vmem:[%s2746_s1 + $0x110] sm:$0xff]  ;;  %v73_v59 = vld [vmem:[%s2746_s1 + $0x108] sm:$0xff] }
  0x15   :  { %1751 = vmatpush3.msra.mxu1 %v79_v35  ;;  %1714 = vmatprep.subr.mxu0 %v62_v36  ;;  %v56_v60 = vld [vmem:[%s2746_s1 + $0x80] sm:$0xff]  ;;  %v31_v63 = vld [vmem:[%s2745_s0 + $0x8] sm:$0xff] }
  0x16   :  { %1752 = vmatprep.subr.mxu1 %v94_v37  ;;  %1715 = vmatpush3.msra.mxu0 %v46_v38  ;;  %v88_v61 = vld [vmem:[%s2746_s1 + $0x180] sm:$0xff] }
  0x17   :  { %1753 = vmatpush3.msra.mxu1 %v78_v39  ;;  %1716 = vmatprep.subr.mxu0 %v61_v40  ;;  %v40_v62 = vld [vmem:[%s2746_s1] sm:$0xff] }
  0x18   :  { %1754 = vmatprep.subr.mxu1 %v93_v41  ;;  %1717 = vmatpush3.msra.mxu0 %v45_v42 }
  0x19   :  { %1755 = vmatpush3.msra.mxu1 %v77_v43  ;;  %1718 = vmatprep.subr.mxu0 %v60_v44 }
  0x1a   :  { %1756 = vmatprep.subr.mxu1 %v92_v45  ;;  %1719 = vmatpush3.msra.mxu0 %v44_v46 }
  0x1b   :  { %1757 = vmatpush3.msra.mxu1 %v76_v47  ;;  %1720 = vmatprep.subr.mxu0 %v59_v48 }
  0x1c   :  { %1758 = vmatprep.subr.mxu1 %v91_v49  ;;  %1721 = vmatpush3.msra.mxu0 %v43_v50 }
  0x1d   :  { %1759 = vmatpush3.msra.mxu1 %v75_v51  ;;  %1722 = vmatprep.subr.mxu0 %v58_v52 }
  0x1e   :  { %1760 = vmatprep.subr.mxu1 %v90_v53  ;;  %1723 = vmatpush3.msra.mxu0 %v42_v54 }
  0x1f   :  { %1761 = vmatpush3.msra.mxu1 %v74_v55  ;;  %1724 = vmatprep.subr.mxu0 %v57_v56 }
  0x20   :  { %1762 = vmatprep.subr.mxu1 %v89_v57 }
  0x21   :  { %13 = vsyncpa [#allocation3], 0  ;;  %1725 = vmatpush3.msra.mxu0 %v41_v58  ;;  %1763 = vmatpush3.msra.mxu1 %v73_v59  ;;  %v72_v0 = vld [vmem:[%s2746_s1 + $0x100] sm:$0xff]  ;;  %v33_v1 = vld [vmem:[%s2745_s0 + $0x18] sm:$0xff]  ;;  %vm127_vm0 = vcmask 1041408   ;;  %v2155_v10 = vmov 0.0  }
  0x22   :  { %1726 = vmatprep.subr.mxu0 %v56_v60  ;;  %1764 = vmatprep.subr.mxu1 %v88_v61  ;;  %v30_v2 = vld [vmem:[%s2745_s0] sm:$0xff]  ;;  %v32_v3 = vld [vmem:[%s2745_s0 + $0x10] sm:$0xff]  ;;  %v111_v6 = vld [vmem:[%s2746_s1 + $0x238] sm:$0xff]  ;;  %vm120_vm1 = vcmask 539648   ;;  %vm2156_vm2 = vmmov 0   ;;  %vm491_vm3 = vcmask 1041409  }
  0x23   :  { %1727 = vmatpush3.msra.mxu0 %v40_v62  ;;  %195 = vmatprep.mubr.f32.mxu0 %v31_v63  ;;  %v112_v4 = vld [vmem:[%s2746_s1 + $0x240] sm:$0x3]  ;;  %v36_v5 = vld [vmem:[%s2745_s0 + $0x30] sm:$0xff]  ;;  %v35_v8 = vld [vmem:[%s2745_s0 + $0x28] sm:$0xff]  ;;  %s2158_s24 = smov 64   ;;  %vm360_vm4 = vcmask 261120  }
  0x24   :  { %1765 = vmatpush3.msra.mxu1 %v72_v0  ;;  %270 = vmatprep.mubr.f32.mxu1 %v33_v1  ;;  %v38_v7 = vld [vmem:[%s2745_s0 + $0x40] sm:$0xff]  ;;  %v110_v9 = vld [vmem:[%s2746_s1 + $0x230] sm:$0xff]  ;;  %v2431_v11 = vld [vmem:[%s2747_s2 + $0x18] sm:$0xff]  ;;  %s2159_s19 = smov [#allocation2]   ;;  %vm1650_vm5 = vcmask 74752  }
  0x25   :  { %196 = vmatmul.mubr.f32.vlgmr.msra.gmra.mxu0 %v30_v2  ;;  %271 = vmatmul.mubr.f32.vlgmr.msra.gmra.mxu1 %v32_v3  ;;  %v109_v12 = vld [vmem:[%s2746_s1 + $0x228] sm:$0xff]  ;;  %v37_v13 = vld [vmem:[%s2745_s0 + $0x38] sm:$0xff]  ;;  %v2443_v14 = vld [vmem:[%s2747_s2 + $0x10] sm:$0xff] }
  0x26   :  { %1845 = vmatprep.subr.msk.mxu1 %vm127_vm0, %v112_v4  ;;  %200 = vmatprep.mubr.f32.mxu0 %v36_v5  ;;  %v108_v15 = vld [vmem:[%s2746_s1 + $0x220] sm:$0xff]  ;;  %v2452_v16 = vld [vmem:[%s2747_s2 + $0x8] sm:$0xff]  ;;  %v107_v17 = vld [vmem:[%s2746_s1 + $0x218] sm:$0xff] }
  0x27   :  { %1846 = vmatpush3.msk.msra.mxu1 %vm127_vm0, %v112_v4  ;;  %1866 = vmatprep.subr.mxu0 %v2155_v10  ;;  %v2462_v18 = vld [vmem:[%s2747_s2] sm:$0xff]  ;;  %v106_v19 = vld [vmem:[%s2746_s1 + $0x210] sm:$0xff]  ;;  %v105_v20 = vld [vmem:[%s2746_s1 + $0x208] sm:$0xff]  ;;  %s1658_s2 = sshll.u32 %s2159_s19, 4  ;;  %s1659_s2 = int_to_ptr.vmem [resolvable:$true] %s1658_s2 }
  0x28   :  { %1847 = vmatprep.subr.mxu1 %v111_v6  ;;  %275 = vmatprep.mubr.f32.mxu1 %v38_v7  ;;  %v34_v21 = vld [vmem:[%s2745_s0 + $0x20] sm:$0xff]  ;;  %v39_v23 = vld [vmem:[%s2745_s0 + $0x48] sm:$0xff]  ;;  %p2138_p1 = scmp.lt.s32.totalorder %s1659_s2, %s1659_s2 }
  0x29   :  { %1848 = vmatpush3.msra.mxu1 %v111_v6  ;;  %201 = vmatmul.mubr.f32.gmra.mxu0 %v35_v8  ;;  %v104_v22 = vld [vmem:[%s2746_s1 + $0x200] sm:$0xff] }
  0x2a   :  { %1849 = vmatprep.subr.mxu1 %v110_v9  ;;  %1867 = vmatpush3.msra.mxu0 %v2431_v11  ;;  %v1666_v34 = vld [vmem:[%s2748_s3] ss:$0 sm:$0xff]  ;;  %s2157_s3 = smov 32  }
  0x2b   :  { %1850 = vmatpush3.msra.mxu1 %v110_v9  ;;  %1868 = vmatprep.subr.mxu0 %v2155_v10 }
  0x2c   :  { %1851 = vmatprep.subr.mxu1 %v109_v12  ;;  %276 = vmatmul.mubr.f32.gmra.mxu1 %v37_v13 }
  0x2d   :  { %1852 = vmatpush3.msra.mxu1 %v109_v12  ;;  %1869 = vmatpush3.msra.mxu0 %v2443_v14 }
  0x2e   :  { %1853 = vmatprep.subr.mxu1 %v108_v15  ;;  %1870 = vmatprep.subr.mxu0 %v2155_v10 }
  0x2f   :  { %1854 = vmatpush3.msra.mxu1 %v108_v15  ;;  %1871 = vmatpush3.msra.mxu0 %v2452_v16 }
  0x30   :  { %1855 = vmatprep.subr.mxu1 %v107_v17  ;;  %1872 = vmatprep.subr.mxu0 %v2155_v10 }
  0x31   :  { %1856 = vmatpush3.msra.mxu1 %v107_v17  ;;  %1873 = vmatpush3.msra.mxu0 %v2462_v18 }
  0x32   :  { %1857 = vmatprep.subr.mxu1 %v106_v19  ;;  %1874 = vmatprep.mubr.msk.f32.mxu0 %vm2156_vm2, %v2155_v10 }
  0x33   :  { %1858 = vmatpush3.msra.mxu1 %v106_v19  ;;  %1875 = vmatmul.mubr.f32.vlgmr.msra.gmra.mxu0 %v2155_v10 }
  0x34   :  { %1859 = vmatprep.subr.mxu1 %v105_v20  ;;  %1863 = vmatprep.mubr.msk.f32.mxu1 %vm120_vm1, %v34_v21 }
  0x35   :  { %1860 = vmatpush3.msra.mxu1 %v105_v20  ;;  %1899 = vmatprep.subr.mxu0 %v2155_v10 }
  0x36   :  { %1861 = vmatprep.subr.mxu1 %v104_v22  ;;  %1900 = vmatpush3.msra.mxu0 %v2431_v11 }
  0x37   :  { %1862 = vmatpush3.msra.mxu1 %v104_v22  ;;  %1901 = vmatprep.subr.mxu0 %v2155_v10 }
  0x38   :  { %1864 = vmatmul.mubr.msk.f32.vlgmr.msra.gmra.mxu1 %vm120_vm1, %v39_v23  ;;  %1877 = vmatprep.subr.mxu1 %v2155_v10 }
  0x39   :  { %1878 = vmatpush3.msra.mxu1 %v2431_v11  ;;  %1885 = vmatprep.mubr.msk.f32.mxu1 %vm2156_vm2, %v2155_v10 }
  0x3a   :  { %1879 = vmatprep.subr.mxu1 %v2155_v10  ;;  %1902 = vmatpush3.msra.mxu0 %v2443_v14 }
  0x3b   :  { %1880 = vmatpush3.msra.mxu1 %v2443_v14  ;;  %1903 = vmatprep.subr.mxu0 %v2155_v10 }
  0x3c   :  { %1881 = vmatprep.subr.mxu1 %v2155_v10  ;;  %1904 = vmatpush3.msra.mxu0 %v2452_v16 }
  0x3d   :  { %1882 = vmatpush3.msra.mxu1 %v2452_v16  ;;  %1905 = vmatprep.subr.mxu0 %v2155_v10 }
  0x3e   :  { %1883 = vmatprep.subr.mxu1 %v2155_v10  ;;  %1906 = vmatpush3.msra.mxu0 %v2462_v18 }
  0x3f   :  { %1884 = vmatpush3.msra.mxu1 %v2462_v18  ;;  %1907 = vmatprep.mubr.msk.f32.mxu0 %vm2156_vm2, %v2155_v10 }
  0x40   :  { %1888 = vmatprep.subr.mxu1 %v2155_v10  ;;  %1921 = vmatprep.subr.mxu0 %v2155_v10 }
  0xe5   :  { %v1728_v24 = vpop.f32.mrf.mxu0  ;;  %v1766_v25 = vpop.f32.mrf.mxu1 }
  0xe7   :  { %v1729_v26 = vpop.f32.mrf.mxu0  ;;  %v1767_v28 = vpop.f32.mrf.mxu1 }
  0xe8   :  { %v1730_v33 = vadd.f32 %v1729_v26, %v1728_v24  ;;  %v1768_v40 = vadd.f32 %v1767_v28, %v1766_v25 }
  0xe9   :  { %v1731_v27 = vpop.f32.mrf.mxu0 }
  0xea   :  { %v198_v38 = vadd.f32 %v1730_v33, %v1666_v34 }
  0xeb   :  { %v1732_v29 = vpop.f32.mrf.mxu0 }
  0xec   :  { %v1769_v30 = vpop.f32.mrf.mxu1  ;;  %v1733_v31 = vadd.f32 %v1732_v29, %v1731_v27  ;;  %v273_v45 = vadd.f32 %v1768_v40, %v198_v38 }
  0xee   :  { %v1770_v32 = vpop.f32.mrf.mxu1  ;;  %v203_v35 = vadd.f32 %v1733_v31, %v1666_v34 }
  0xef   :  { %v1771_v36 = vadd.f32 %v1770_v32, %v1769_v30 }
  0xf1   :  { %v278_v42 = vadd.f32 %v1771_v36, %v203_v35 }
  0xf3   :  { %v430_v37 = vpop.f32.mrf.mxu0 }
  0xf4   :  { %v435_v41 = vrot.slane %v430_v37, 1 }
  0xf5   :  { %v1876_v39 = vpop.f32.mrf.mxu0 }
  0xf8   :  { %v1865_v43 = vpop.f32.mrf.mxu1 }
  0xf9   :  { %v2512_v44 = vadd.f32 %v1865_v43, %v278_v42 }
  0xfa   :  { %v347_v46 = vpop.f32.mrf.mxu1 }
  0xfb   :  { %v2514_v47 = vadd.f32 %v347_v46, %v273_v45  ;;  %v439_v48 = vadd.f32 %v435_v41, %v2512_v44 }
  0xfd   :  { %v438_v49 = vadd.f32 %v430_v37, %v2514_v47  ;;  %2005 = vtanh.f32 %v439_v48  ;;  %v1671_v52 = vmul.f32 -1.442695, %v439_v48 }
  0xff   :  { %2007 = vtanh.f32 %v438_v49  ;;  %v1670_v53 = vmul.f32 -1.442695, %v438_v49 }
 0x100   :  { %2009 = vpow2.f32 %v1671_v52 }
 0x101   :  { %2011 = vpow2.f32 %v1670_v53 }
 0x10a   :  { %v2006_v50 = vpop.eup %2005 }
 0x10b   :  { %460 = vrot.lane.b32.xlu0 %v2006_v50, %s2157_s3 }
 0x10c   :  { %v2008_v51 = vpop.eup %2007 }
 0x10d   :  { %v2010_v54 = vpop.eup %2009 }
 0x10e   :  { %v447_v55 = vadd.f32 1.0, %v2010_v54  ;;  %v2012_v56 = vpop.eup %2011 }
 0x10f   :  { %458 = vrot.lane.b32.xlu0 %v2008_v51, %s2157_s3  ;;  %v446_v57 = vadd.f32 1.0, %v2012_v56 }
 0x110   :  { %2013 = vrcp.f32 %v447_v55 }
 0x111   :  { %2015 = vrcp.f32 %v446_v57 }
 0x11d   :  { %v2014_v58 = vpop.eup %2013 }
 0x11e   :  { %v2016_v61 = vpop.eup %2015  ;;  %v455_v0 = vmul.f32 0.0, %v2014_v58 }
 0x11f   :  { %v454_v3 = vmul.f32 0.0, %v2016_v61 }
 0x17d   :  { %v461_v59 = vpop.permute.xlu0 %460 }
 0x17e   :  { %v465_v60 = vmul.f32 %v2014_v58, %v461_v59 }
 0x180   :  { %470 = vrot.lane.b32.xlu1 %v465_v60, %s2157_s3 }
 0x181   :  { %v459_v62 = vpop.permute.xlu0 %458 }
 0x182   :  { %v464_v63 = vmul.f32 %v2016_v61, %v459_v62 }
 0x184   :  { %468 = vrot.lane.b32.xlu1 %v464_v63, %s2157_s3 }
 0x1f2   :  { %v471_v1 = vpop.permute.xlu1 %470 }
 0x1f3   :  { %v475_v2 = vadd.f32 %v471_v1, %v455_v0 }
 0x1f5   :  { %2017 = vtanh.f32 %v475_v2  ;;  %v590_v39 = vrot.slane %v475_v2, 7 }
 0x1f6   :  { %v469_v4 = vpop.permute.xlu1 %468 }
 0x1f7   :  { %v474_v5 = vadd.f32 %v469_v4, %v454_v3 }
 0x1f9   :  { %2019 = vtanh.f32 %v474_v5  ;;  %v589_v41 = vrot.slane %v474_v5, 7 }
 0x202   :  { %v2018_v6 = vpop.eup %2017 }
 0x203   :  { %482 = vrot.lane.b32.xlu0 %v2018_v6, %s2157_s3 }
 0x206   :  { %v2020_v7 = vpop.eup %2019 }
 0x207   :  { %480 = vrot.lane.b32.xlu1 %v2020_v7, %s2157_s3 }
 0x275   :  { %v483_v8 = vpop.permute.xlu0 %482 }
 0x276   :  { %v487_v9 = vmul.f32 %v2014_v58, %v483_v8 }
 0x278   :  { %v490_v13 = vrot.slane %v487_v9, 7 }
 0x279   :  { %v481_v12 = vpop.permute.xlu1 %480 }
 0x27a   :  { %v486_v15 = vmul.f32 %v2016_v61, %v481_v12 }
 0x27c   :  { %v492_v17 = vsel %vm491_vm3, %v490_v13, %v486_v15 }
 0x27d   :  { %493 = vrot.lane.b32.xlu0 %v492_v17, %s2158_s24 }
 0x2ef   :  { %v494_v19 = vpop.permute.xlu0 %493 }
 0x2f0   :  { %1886 = vmatmul.mubr.msk.f32.vlgmr.msra.gmra.mxu1 %vm360_vm4, %v494_v19 }
 0x2f1   :  { %1889 = vmatpush3.msra.mxu1 %v2431_v11  ;;  %1896 = vmatprep.mubr.msk.f32.mxu1 %vm2156_vm2, %v2155_v10 }
 0x2f2   :  { %1890 = vmatprep.subr.mxu1 %v2155_v10 }
 0x2f3   :  { %1891 = vmatpush3.msra.mxu1 %v2443_v14 }
 0x2f4   :  { %1892 = vmatprep.subr.mxu1 %v2155_v10 }
 0x2f5   :  { %1893 = vmatpush3.msra.mxu1 %v2452_v16 }
 0x2f6   :  { %1894 = vmatprep.subr.mxu1 %v2155_v10 }
 0x2f7   :  { %1895 = vmatpush3.msra.mxu1 %v2462_v18 }
 0x2f8   :  { %1910 = vmatprep.subr.mxu1 %v2155_v10 }
 0x3b0   :  { %v563_v20 = vpop.f32.mrf.mxu1 }
 0x3b1   :  { %v568_v21 = vrot.slane %v563_v20, 7  ;;  %v572_v22 = vadd.f32 %v563_v20, %v2512_v44 }
 0x3b2   :  { %v1887_v23 = vpop.f32.mrf.mxu1 }
 0x3b3   :  { %v571_v24 = vadd.f32 %v568_v21, %v2514_v47  ;;  %2021 = vtanh.f32 %v572_v22  ;;  %v1674_v27 = vmul.f32 -1.442695, %v572_v22 }
 0x3b5   :  { %2023 = vtanh.f32 %v571_v24  ;;  %v1673_v28 = vmul.f32 -1.442695, %v571_v24 }
 0x3b6   :  { %2025 = vpow2.f32 %v1674_v27 }
 0x3b7   :  { %2027 = vpow2.f32 %v1673_v28 }
 0x3c0   :  { %v2022_v25 = vpop.eup %2021 }
 0x3c1   :  { %599 = vrot.lane.b32.xlu0 %v2022_v25, %s2157_s3 }
 0x3c2   :  { %v2024_v26 = vpop.eup %2023 }
 0x3c3   :  { %597 = vrot.lane.b32.xlu1 %v2024_v26, %s2157_s3  ;;  %v2026_v29 = vpop.eup %2025 }
 0x3c4   :  { %v2028_v30 = vpop.eup %2027  ;;  %v580_v31 = vadd.f32 1.0, %v2026_v29 }
 0x3c5   :  { %v579_v32 = vadd.f32 1.0, %v2028_v30 }
 0x3c6   :  { %2029 = vrcp.f32 %v580_v31 }
 0x3c7   :  { %2031 = vrcp.f32 %v579_v32 }
 0x3d3   :  { %v2030_v33 = vpop.eup %2029 }
 0x3d4   :  { %v2032_v36 = vpop.eup %2031  ;;  %v594_v40 = vmul.f32 %v2030_v33, %v590_v39 }
 0x3d5   :  { %v593_v45 = vmul.f32 %v2032_v36, %v589_v41 }
 0x433   :  { %v600_v34 = vpop.permute.xlu0 %599 }
 0x434   :  { %v604_v35 = vmul.f32 %v2030_v33, %v600_v34 }
 0x435   :  { %v598_v37 = vpop.permute.xlu1 %597 }
 0x436   :  { %609 = vrot.lane.b32.xlu0 %v604_v35, %s2157_s3  ;;  %v603_v38 = vmul.f32 %v2032_v36, %v598_v37 }
 0x438   :  { %607 = vrot.lane.b32.xlu1 %v603_v38, %s2157_s3 }
 0x4a8   :  { %v610_v42 = vpop.permute.xlu0 %609 }
 0x4a9   :  { %v614_v43 = vadd.f32 %v610_v42, %v594_v40 }
 0x4aa   :  { %v608_v46 = vpop.permute.xlu1 %607 }
 0x4ab   :  { %2033 = vtanh.f32 %v614_v43  ;;  %v613_v48 = vadd.f32 %v608_v46, %v593_v45  ;;  %v729_v20 = vrot.slane %v614_v43, 7 }
 0x4ad   :  { %2035 = vtanh.f32 %v613_v48  ;;  %v728_v19 = vrot.slane %v613_v48, 7 }
 0x4b8   :  { %v2034_v49 = vpop.eup %2033 }
 0x4b9   :  { %621 = vrot.lane.b32.xlu0 %v2034_v49, %s2157_s3 }
 0x4ba   :  { %v2036_v50 = vpop.eup %2035 }
 0x4bb   :  { %619 = vrot.lane.b32.xlu1 %v2036_v50, %s2157_s3 }
 0x52b   :  { %v622_v51 = vpop.permute.xlu0 %621 }
 0x52c   :  { %v626_v54 = vmul.f32 %v2030_v33, %v622_v51 }
 0x52d   :  { %v620_v52 = vpop.permute.xlu1 %619 }
 0x52e   :  { %v625_v53 = vmul.f32 %v2032_v36, %v620_v52 }
 0x530   :  { %v629_v55 = vrot.slane %v625_v53, 1 }
 0x532   :  { %v630_v56 = vsel %vm491_vm3, %v626_v54, %v629_v55 }
 0x533   :  { %631 = vrot.lane.b32.xlu1 %v630_v56, %s2158_s24 }
 0x5a5   :  { %v632_v57 = vpop.permute.xlu1 %631 }
 0x5a6   :  { %1897 = vmatmul.mubr.msk.f32.vlgmr.msra.gmra.mxu1 %vm360_vm4, %v632_v57 }
 0x5a7   :  { %1911 = vmatpush3.msra.mxu1 %v2431_v11  ;;  %1918 = vmatprep.mubr.msk.f32.mxu1 %vm2156_vm2, %v2155_v10 }
 0x5a8   :  { %1912 = vmatprep.subr.mxu1 %v2155_v10 }
 0x5a9   :  { %1913 = vmatpush3.msra.mxu1 %v2443_v14 }
 0x5aa   :  { %1914 = vmatprep.subr.mxu1 %v2155_v10 }
 0x5ab   :  { %1915 = vmatpush3.msra.mxu1 %v2452_v16 }
 0x5ac   :  { %1916 = vmatprep.subr.mxu1 %v2155_v10 }
 0x5ad   :  { %1917 = vmatpush3.msra.mxu1 %v2462_v18 }
 0x5ae   :  { %1932 = vmatprep.subr.mxu1 %v2155_v10 }
 0x666   :  { %v701_v58 = vpop.f32.mrf.mxu1 }
 0x667   :  { %v706_v59 = vrot.slane %v701_v58, 6  ;;  %v707_v60 = vrot.slane %v701_v58, 7 }
 0x668   :  { %v1898_v61 = vpop.f32.mrf.mxu1 }
 0x669   :  { %v710_v62 = vadd.f32 %v706_v59, %v2514_v47  ;;  %v711_v63 = vadd.f32 %v707_v60, %v2512_v44 }
 0x66b   :  { %2037 = vtanh.f32 %v710_v62  ;;  %v1676_v2 = vmul.f32 -1.442695, %v710_v62  ;;  %v1677_v3 = vmul.f32 -1.442695, %v711_v63 }
 0x66c   :  { %2039 = vtanh.f32 %v711_v63 }
 0x66d   :  { %2041 = vpow2.f32 %v1676_v2 }
 0x66e   :  { %2043 = vpow2.f32 %v1677_v3 }
 0x678   :  { %v2038_v0 = vpop.eup %2037 }
 0x679   :  { %v2040_v1 = vpop.eup %2039  ;;  %736 = vrot.lane.b32.xlu0 %v2038_v0, %s2157_s3 }
 0x67a   :  { %738 = vrot.lane.b32.xlu1 %v2040_v1, %s2157_s3  ;;  %v2042_v4 = vpop.eup %2041 }
 0x67b   :  { %v2044_v5 = vpop.eup %2043  ;;  %v718_v6 = vadd.f32 1.0, %v2042_v4 }
 0x67c   :  { %v719_v7 = vadd.f32 1.0, %v2044_v5 }
 0x67d   :  { %2045 = vrcp.f32 %v718_v6 }
 0x67e   :  { %2047 = vrcp.f32 %v719_v7 }
 0x68a   :  { %v2046_v8 = vpop.eup %2045 }
 0x68b   :  { %v2048_v12 = vpop.eup %2047  ;;  %v732_v21 = vmul.f32 %v2046_v8, %v728_v19 }
 0x68c   :  { %v733_v22 = vmul.f32 %v2048_v12, %v729_v20 }
 0x6eb   :  { %v737_v9 = vpop.permute.xlu0 %736 }
 0x6ec   :  { %v739_v13 = vpop.permute.xlu1 %738  ;;  %v742_v15 = vmul.f32 %v2046_v8, %v737_v9 }
 0x6ed   :  { %v743_v17 = vmul.f32 %v2048_v12, %v739_v13 }
 0x6ee   :  { %746 = vrot.lane.b32.xlu0 %v742_v15, %s2157_s3 }
 0x6ef   :  { %748 = vrot.lane.b32.xlu1 %v743_v17, %s2157_s3 }
 0x760   :  { %v747_v23 = vpop.permute.xlu0 %746 }
 0x761   :  { %v749_v24 = vpop.permute.xlu1 %748  ;;  %v752_v25 = vadd.f32 %v747_v23, %v732_v21 }
 0x762   :  { %v753_v26 = vadd.f32 %v749_v24, %v733_v22 }
 0x763   :  { %2049 = vtanh.f32 %v752_v25  ;;  %v868_v59 = vrot.slane %v752_v25, 7 }
 0x764   :  { %2051 = vtanh.f32 %v753_v26  ;;  %v869_v60 = vrot.slane %v753_v26, 7 }
 0x770   :  { %v2050_v27 = vpop.eup %2049 }
 0x771   :  { %v2052_v28 = vpop.eup %2051  ;;  %758 = vrot.lane.b32.xlu0 %v2050_v27, %s2157_s3 }
 0x772   :  { %760 = vrot.lane.b32.xlu1 %v2052_v28, %s2157_s3 }
 0x7e3   :  { %v759_v29 = vpop.permute.xlu0 %758 }
 0x7e4   :  { %v761_v30 = vpop.permute.xlu1 %760  ;;  %v764_v31 = vmul.f32 %v2046_v8, %v759_v29 }
 0x7e5   :  { %v765_v32 = vmul.f32 %v2048_v12, %v761_v30 }
 0x7e6   :  { %v768_v33 = vrot.slane %v764_v31, 2 }
 0x7e7   :  { %v769_v34 = vrot.slane %v765_v32, 1 }
 0x7e9   :  { %v770_v35 = vsel %vm491_vm3, %v769_v34, %v768_v33 }
 0x7ea   :  { %771 = vrot.lane.b32.xlu0 %v770_v35, %s2158_s24 }
 0x85c   :  { %v772_v36 = vpop.permute.xlu0 %771 }
 0x85d   :  { %1908 = vmatmul.mubr.msk.f32.vlgmr.msra.gmra.mxu0 %vm360_vm4, %v772_v36 }
 0x85e   :  { %1922 = vmatpush3.msra.mxu0 %v2431_v11  ;;  %1929 = vmatprep.mubr.msk.f32.mxu0 %vm2156_vm2, %v2155_v10 }
 0x85f   :  { %1923 = vmatprep.subr.mxu0 %v2155_v10 }
 0x860   :  { %1924 = vmatpush3.msra.mxu0 %v2443_v14 }
 0x861   :  { %1925 = vmatprep.subr.mxu0 %v2155_v10 }
 0x862   :  { %1926 = vmatpush3.msra.mxu0 %v2452_v16 }
 0x863   :  { %1927 = vmatprep.subr.mxu0 %v2155_v10 }
 0x864   :  { %1928 = vmatpush3.msra.mxu0 %v2462_v18 }
 0x865   :  { %1943 = vmatprep.subr.mxu0 %v2155_v10 }
 0x91d   :  { %v841_v37 = vpop.f32.mrf.mxu0 }
 0x91e   :  { %v846_v38 = vrot.slane %v841_v37, 5  ;;  %v847_v39 = vrot.slane %v841_v37, 6 }
 0x91f   :  { %v1909_v40 = vpop.f32.mrf.mxu0 }
 0x920   :  { %v850_v41 = vadd.f32 %v846_v38, %v2514_v47  ;;  %v851_v42 = vadd.f32 %v847_v39, %v2512_v44 }
 0x922   :  { %2053 = vtanh.f32 %v850_v41  ;;  %v1679_v46 = vmul.f32 -1.442695, %v850_v41  ;;  %v1680_v48 = vmul.f32 -1.442695, %v851_v42 }
 0x923   :  { %2055 = vtanh.f32 %v851_v42 }
 0x924   :  { %2057 = vpow2.f32 %v1679_v46 }
 0x925   :  { %2059 = vpow2.f32 %v1680_v48 }
 0x92f   :  { %v2054_v43 = vpop.eup %2053 }
 0x930   :  { %v2056_v45 = vpop.eup %2055  ;;  %876 = vrot.lane.b32.xlu1 %v2054_v43, %s2157_s3 }
 0x931   :  { %878 = vrot.lane.b32.xlu0 %v2056_v45, %s2157_s3  ;;  %v2058_v49 = vpop.eup %2057 }
 0x932   :  { %v2060_v50 = vpop.eup %2059  ;;  %v858_v51 = vadd.f32 1.0, %v2058_v49 }
 0x933   :  { %v859_v52 = vadd.f32 1.0, %v2060_v50 }
 0x934   :  { %2061 = vrcp.f32 %v858_v51 }
 0x935   :  { %2063 = vrcp.f32 %v859_v52 }
 0x941   :  { %v2062_v53 = vpop.eup %2061 }
 0x942   :  { %v2064_v55 = vpop.eup %2063  ;;  %v872_v61 = vmul.f32 %v2062_v53, %v868_v59 }
 0x943   :  { %v873_v62 = vmul.f32 %v2064_v55, %v869_v60 }
 0x9a2   :  { %v877_v54 = vpop.permute.xlu1 %876 }
 0x9a3   :  { %v879_v56 = vpop.permute.xlu0 %878  ;;  %v882_v57 = vmul.f32 %v2062_v53, %v877_v54 }
 0x9a4   :  { %v883_v58 = vmul.f32 %v2064_v55, %v879_v56 }
 0x9a5   :  { %886 = vrot.lane.b32.xlu1 %v882_v57, %s2157_s3 }
 0x9a6   :  { %888 = vrot.lane.b32.xlu0 %v883_v58, %s2157_s3 }
 0xa17   :  { %v887_v63 = vpop.permute.xlu1 %886 }
 0xa18   :  { %v889_v0 = vpop.permute.xlu0 %888  ;;  %v892_v1 = vadd.f32 %v887_v63, %v872_v61 }
 0xa19   :  { %v893_v2 = vadd.f32 %v889_v0, %v873_v62 }
 0xa1a   :  { %2065 = vtanh.f32 %v892_v1  ;;  %v1008_v38 = vrot.slane %v892_v1, 7 }
 0xa1b   :  { %2067 = vtanh.f32 %v893_v2  ;;  %v1009_v39 = vrot.slane %v893_v2, 7 }
 0xa27   :  { %v2066_v3 = vpop.eup %2065 }
 0xa28   :  { %v2068_v4 = vpop.eup %2067  ;;  %898 = vrot.lane.b32.xlu1 %v2066_v3, %s2157_s3 }
 0xa29   :  { %900 = vrot.lane.b32.xlu0 %v2068_v4, %s2157_s3 }
 0xa9a   :  { %v899_v5 = vpop.permute.xlu1 %898 }
 0xa9b   :  { %v901_v6 = vpop.permute.xlu0 %900  ;;  %v904_v7 = vmul.f32 %v2062_v53, %v899_v5 }
 0xa9c   :  { %v905_v8 = vmul.f32 %v2064_v55, %v901_v6 }
 0xa9d   :  { %v908_v9 = vrot.slane %v904_v7, 3 }
 0xa9e   :  { %v909_v12 = vrot.slane %v905_v8, 2 }
 0xaa0   :  { %v910_v13 = vsel %vm491_vm3, %v909_v12, %v908_v9 }
 0xaa1   :  { %911 = vrot.lane.b32.xlu1 %v910_v13, %s2158_s24 }
 0xb13   :  { %v912_v15 = vpop.permute.xlu1 %911 }
 0xb14   :  { %1919 = vmatmul.mubr.msk.f32.vlgmr.msra.gmra.mxu1 %vm360_vm4, %v912_v15 }
 0xb15   :  { %1933 = vmatpush3.msra.mxu1 %v2431_v11  ;;  %1940 = vmatprep.mubr.msk.f32.mxu1 %vm2156_vm2, %v2155_v10 }
 0xb16   :  { %1934 = vmatprep.subr.mxu1 %v2155_v10 }
 0xb17   :  { %1935 = vmatpush3.msra.mxu1 %v2443_v14 }
 0xb18   :  { %1936 = vmatprep.subr.mxu1 %v2155_v10 }
 0xb19   :  { %1937 = vmatpush3.msra.mxu1 %v2452_v16 }
 0xb1a   :  { %1938 = vmatprep.subr.mxu1 %v2155_v10 }
 0xb1b   :  { %1939 = vmatpush3.msra.mxu1 %v2462_v18 }
 0xb1c   :  { %1954 = vmatprep.subr.mxu1 %v2155_v10 }
 0xbd4   :  { %v981_v17 = vpop.f32.mrf.mxu1 }
 0xbd5   :  { %v986_v19 = vrot.slane %v981_v17, 4  ;;  %v987_v20 = vrot.slane %v981_v17, 5 }
 0xbd6   :  { %v1920_v21 = vpop.f32.mrf.mxu1 }
 0xbd7   :  { %v990_v22 = vadd.f32 %v986_v19, %v2514_v47  ;;  %v991_v23 = vadd.f32 %v987_v20, %v2512_v44 }
 0xbd9   :  { %2069 = vtanh.f32 %v990_v22  ;;  %v1682_v26 = vmul.f32 -1.442695, %v990_v22  ;;  %v1683_v27 = vmul.f32 -1.442695, %v991_v23 }
 0xbda   :  { %2071 = vtanh.f32 %v991_v23 }
 0xbdb   :  { %2073 = vpow2.f32 %v1682_v26 }
 0xbdc   :  { %2075 = vpow2.f32 %v1683_v27 }
 0xbe6   :  { %v2070_v24 = vpop.eup %2069 }
 0xbe7   :  { %v2072_v25 = vpop.eup %2071  ;;  %1016 = vrot.lane.b32.xlu0 %v2070_v24, %s2157_s3 }
 0xbe8   :  { %1018 = vrot.lane.b32.xlu1 %v2072_v25, %s2157_s3  ;;  %v2074_v28 = vpop.eup %2073 }
 0xbe9   :  { %v2076_v29 = vpop.eup %2075  ;;  %v998_v30 = vadd.f32 1.0, %v2074_v28 }
 0xbea   :  { %v999_v31 = vadd.f32 1.0, %v2076_v29 }
 0xbeb   :  { %2077 = vrcp.f32 %v998_v30 }
 0xbec   :  { %2079 = vrcp.f32 %v999_v31 }
 0xbf8   :  { %v2078_v32 = vpop.eup %2077 }
 0xbf9   :  { %v2080_v34 = vpop.eup %2079  ;;  %v1012_v40 = vmul.f32 %v2078_v32, %v1008_v38 }
 0xbfa   :  { %v1013_v41 = vmul.f32 %v2080_v34, %v1009_v39 }
 0xc59   :  { %v1017_v33 = vpop.permute.xlu0 %1016 }
 0xc5a   :  { %v1019_v35 = vpop.permute.xlu1 %1018  ;;  %v1022_v36 = vmul.f32 %v2078_v32, %v1017_v33 }
 0xc5b   :  { %v1023_v37 = vmul.f32 %v2080_v34, %v1019_v35 }
 0xc5c   :  { %1026 = vrot.lane.b32.xlu0 %v1022_v36, %s2157_s3 }
 0xc5d   :  { %1028 = vrot.lane.b32.xlu1 %v1023_v37, %s2157_s3 }
 0xcce   :  { %v1027_v42 = vpop.permute.xlu0 %1026 }
 0xccf   :  { %v1029_v43 = vpop.permute.xlu1 %1028  ;;  %v1032_v45 = vadd.f32 %v1027_v42, %v1012_v40 }
 0xcd0   :  { %v1033_v46 = vadd.f32 %v1029_v43, %v1013_v41 }
 0xcd1   :  { %2081 = vtanh.f32 %v1032_v45  ;;  %v1148_v12 = vrot.slane %v1032_v45, 7 }
 0xcd2   :  { %2083 = vtanh.f32 %v1033_v46  ;;  %v1149_v13 = vrot.slane %v1033_v46, 7 }
 0xcde   :  { %v2082_v48 = vpop.eup %2081 }
 0xcdf   :  { %v2084_v49 = vpop.eup %2083  ;;  %1038 = vrot.lane.b32.xlu0 %v2082_v48, %s2157_s3 }
 0xce0   :  { %1040 = vrot.lane.b32.xlu1 %v2084_v49, %s2157_s3 }
 0xd51   :  { %v1039_v50 = vpop.permute.xlu0 %1038 }
 0xd52   :  { %v1041_v51 = vpop.permute.xlu1 %1040  ;;  %v1044_v52 = vmul.f32 %v2078_v32, %v1039_v50 }
 0xd53   :  { %v1045_v53 = vmul.f32 %v2080_v34, %v1041_v51 }
 0xd54   :  { %v1048_v54 = vrot.slane %v1044_v52, 4 }
 0xd55   :  { %v1049_v55 = vrot.slane %v1045_v53, 3 }
 0xd57   :  { %v1050_v56 = vsel %vm491_vm3, %v1049_v55, %v1048_v54 }
 0xd58   :  { %1051 = vrot.lane.b32.xlu0 %v1050_v56, %s2158_s24 }
 0xdca   :  { %v1052_v57 = vpop.permute.xlu0 %1051 }
 0xdcb   :  { %1930 = vmatmul.mubr.msk.f32.vlgmr.msra.gmra.mxu0 %vm360_vm4, %v1052_v57 }
 0xdcc   :  { %1944 = vmatpush3.msra.mxu0 %v2431_v11  ;;  %1951 = vmatprep.mubr.msk.f32.mxu0 %vm2156_vm2, %v2155_v10 }
 0xdcd   :  { %1945 = vmatprep.subr.mxu0 %v2155_v10 }
 0xdce   :  { %1946 = vmatpush3.msra.mxu0 %v2443_v14 }
 0xdcf   :  { %1947 = vmatprep.subr.mxu0 %v2155_v10 }
 0xdd0   :  { %1948 = vmatpush3.msra.mxu0 %v2452_v16 }
 0xdd1   :  { %1949 = vmatprep.subr.mxu0 %v2155_v10 }
 0xdd2   :  { %1950 = vmatpush3.msra.mxu0 %v2462_v18 }
 0xdd3   :  { %1965 = vmatprep.subr.mxu0 %v2155_v10 }
 0xe8b   :  { %v1121_v58 = vpop.f32.mrf.mxu0 }
 0xe8c   :  { %v1126_v59 = vrot.slane %v1121_v58, 3  ;;  %v1127_v11 = vrot.slane %v1121_v58, 4 }
 0xe8d   :  { %v1931_v60 = vpop.f32.mrf.mxu0 }
 0xe8e   :  { %v1130_v61 = vadd.f32 %v1126_v59, %v2514_v47  ;;  %v1131_v62 = vadd.f32 %v1127_v11, %v2512_v44 }
 0xe90   :  { %2085 = vtanh.f32 %v1130_v61  ;;  %v1685_v16 = vmul.f32 -1.442695, %v1130_v61  ;;  %v1686_v18 = vmul.f32 -1.442695, %v1131_v62 }
 0xe91   :  { %2087 = vtanh.f32 %v1131_v62 }
 0xe92   :  { %2089 = vpow2.f32 %v1685_v16 }
 0xe93   :  { %2091 = vpow2.f32 %v1686_v18 }
 0xe9d   :  { %v2086_v14 = vpop.eup %2085 }
 0xe9e   :  { %v2088_v63 = vpop.eup %2087  ;;  %1156 = vrot.lane.b32.xlu1 %v2086_v14, %s2157_s3 }
 0xe9f   :  { %1158 = vrot.lane.b32.xlu0 %v2088_v63, %s2157_s3  ;;  %v2090_v0 = vpop.eup %2089 }
 0xea0   :  { %v2092_v1 = vpop.eup %2091  ;;  %v1138_v2 = vadd.f32 1.0, %v2090_v0 }
 0xea1   :  { %v1139_v3 = vadd.f32 1.0, %v2092_v1 }
 0xea2   :  { %2093 = vrcp.f32 %v1138_v2 }
 0xea3   :  { %2095 = vrcp.f32 %v1139_v3 }
 0xeaf   :  { %v2094_v4 = vpop.eup %2093 }
 0xeb0   :  { %v2096_v6 = vpop.eup %2095  ;;  %v1152_v15 = vmul.f32 %v2094_v4, %v1148_v12 }
 0xeb1   :  { %v1153_v17 = vmul.f32 %v2096_v6, %v1149_v13 }
 0xf10   :  { %v1157_v5 = vpop.permute.xlu1 %1156 }
 0xf11   :  { %v1159_v7 = vpop.permute.xlu0 %1158  ;;  %v1162_v8 = vmul.f32 %v2094_v4, %v1157_v5 }
 0xf12   :  { %v1163_v9 = vmul.f32 %v2096_v6, %v1159_v7 }
 0xf13   :  { %1166 = vrot.lane.b32.xlu1 %v1162_v8, %s2157_s3 }
 0xf14   :  { %1168 = vrot.lane.b32.xlu0 %v1163_v9, %s2157_s3 }
 0xf85   :  { %v1167_v19 = vpop.permute.xlu1 %1166 }
 0xf86   :  { %v1169_v20 = vpop.permute.xlu0 %1168  ;;  %v1172_v21 = vadd.f32 %v1167_v19, %v1152_v15 }
 0xf87   :  { %v1173_v22 = vadd.f32 %v1169_v20, %v1153_v17 }
 0xf88   :  { %2097 = vtanh.f32 %v1172_v21  ;;  %v1288_v55 = vrot.slane %v1172_v21, 7 }
 0xf89   :  { %2099 = vtanh.f32 %v1173_v22  ;;  %v1289_v56 = vrot.slane %v1173_v22, 7 }
 0xf95   :  { %v2098_v23 = vpop.eup %2097 }
 0xf96   :  { %v2100_v24 = vpop.eup %2099  ;;  %1178 = vrot.lane.b32.xlu1 %v2098_v23, %s2157_s3 }
 0xf97   :  { %1180 = vrot.lane.b32.xlu0 %v2100_v24, %s2157_s3 }
0x1008   :  { %v1179_v25 = vpop.permute.xlu1 %1178 }
0x1009   :  { %v1181_v26 = vpop.permute.xlu0 %1180  ;;  %v1184_v27 = vmul.f32 %v2094_v4, %v1179_v25 }
0x100a   :  { %v1185_v28 = vmul.f32 %v2096_v6, %v1181_v26 }
0x100b   :  { %v1188_v29 = vrot.slane %v1184_v27, 5 }
0x100c   :  { %v1189_v30 = vrot.slane %v1185_v28, 4 }
0x100e   :  { %v1190_v31 = vsel %vm491_vm3, %v1189_v30, %v1188_v29 }
0x100f   :  { %1191 = vrot.lane.b32.xlu1 %v1190_v31, %s2158_s24 }
0x1081   :  { %v1192_v32 = vpop.permute.xlu1 %1191 }
0x1082   :  { %1941 = vmatmul.mubr.msk.f32.vlgmr.msra.gmra.mxu1 %vm360_vm4, %v1192_v32 }
0x1083   :  { %1962 = vmatprep.mubr.msk.f32.mxu1 %vm2156_vm2, %v2155_v10 }
0x1142   :  { %v1261_v33 = vpop.f32.mrf.mxu1 }
0x1143   :  { %v1266_v34 = vrot.slane %v1261_v33, 2  ;;  %v1267_v35 = vrot.slane %v1261_v33, 3 }
0x1144   :  { %v1942_v36 = vpop.f32.mrf.mxu1 }
0x1145   :  { %v1270_v37 = vadd.f32 %v1266_v34, %v2514_v47  ;;  %v1271_v38 = vadd.f32 %v1267_v35, %v2512_v44  ;;  %v1469_v36 = vld [vmem:[%s2749_s4 + $0x18] sm:$0xff] }
0x1146   :  { %1955 = vmatpush3.msra.mxu1 %v1469_v36 }
0x1147   :  { %2101 = vtanh.f32 %v1270_v37  ;;  %v1688_v41 = vmul.f32 -1.442695, %v1270_v37  ;;  %v1689_v42 = vmul.f32 -1.442695, %v1271_v38  ;;  %v1468_v37 = vld [vmem:[%s2749_s4 + $0x10] sm:$0xff]  ;;  %1956 = vmatprep.subr.mxu1 %v2155_v10 }
0x1148   :  { %2103 = vtanh.f32 %v1271_v38  ;;  %v1467_v38 = vld [vmem:[%s2749_s4 + $0x8] sm:$0xff]  ;;  %1957 = vmatpush3.msra.mxu1 %v1468_v37 }
0x1149   :  { %2105 = vpow2.f32 %v1688_v41  ;;  %1958 = vmatprep.subr.mxu1 %v2155_v10 }
0x114a   :  { %2107 = vpow2.f32 %v1689_v42  ;;  %1959 = vmatpush3.msra.mxu1 %v1467_v38  ;;  %v1572_v42 = vld [vmem:[%s2751_s6 + $0x78] sm:$0xff] }
0x114b   :  { %1960 = vmatprep.subr.mxu1 %v2155_v10 }
0x1154   :  { %v2102_v39 = vpop.eup %2101 }
0x1155   :  { %v2104_v40 = vpop.eup %2103  ;;  %1296 = vrot.lane.b32.xlu0 %v2102_v39, %s2157_s3  ;;  %v1466_v39 = vld [vmem:[%s2749_s4] sm:$0xff] }
0x1156   :  { %1298 = vrot.lane.b32.xlu1 %v2104_v40, %s2157_s3  ;;  %v2106_v43 = vpop.eup %2105  ;;  %1961 = vmatpush3.msra.mxu1 %v1466_v39 }
0x1157   :  { %v2108_v45 = vpop.eup %2107  ;;  %v1278_v46 = vadd.f32 1.0, %v2106_v43  ;;  %v1571_v43 = vld [vmem:[%s2751_s6 + $0x70] sm:$0xff] }
0x1158   :  { %v1279_v48 = vadd.f32 1.0, %v2108_v45  ;;  %v1570_v45 = vld [vmem:[%s2751_s6 + $0x68] sm:$0xff] }
0x1159   :  { %2109 = vrcp.f32 %v1278_v46  ;;  %v1569_v46 = vld [vmem:[%s2751_s6 + $0x60] sm:$0xff] }
0x115a   :  { %2111 = vrcp.f32 %v1279_v48 }
0x1166   :  { %v2110_v49 = vpop.eup %2109 }
0x1167   :  { %v2112_v51 = vpop.eup %2111  ;;  %v1292_v57 = vmul.f32 %v2110_v49, %v1288_v55 }
0x1168   :  { %v1293_v58 = vmul.f32 %v2112_v51, %v1289_v56  ;;  %v1566_v56 = vld [vmem:[%s2751_s6 + $0x48] sm:$0xff] }
0x11c7   :  { %v1297_v50 = vpop.permute.xlu0 %1296 }
0x11c8   :  { %v1299_v52 = vpop.permute.xlu1 %1298  ;;  %v1302_v53 = vmul.f32 %v2110_v49, %v1297_v50 }
0x11c9   :  { %v1303_v54 = vmul.f32 %v2112_v51, %v1299_v52 }
0x11ca   :  { %1306 = vrot.lane.b32.xlu0 %v1302_v53, %s2157_s3  ;;  %v1567_v53 = vld [vmem:[%s2751_s6 + $0x50] sm:$0xff] }
0x11cb   :  { %1308 = vrot.lane.b32.xlu1 %v1303_v54, %s2157_s3 }
0x123c   :  { %v1307_v59 = vpop.permute.xlu0 %1306 }
0x123d   :  { %v1309_v11 = vpop.permute.xlu1 %1308  ;;  %v1312_v60 = vadd.f32 %v1307_v59, %v1292_v57  ;;  %v1564_v59 = vld [vmem:[%s2751_s6 + $0x38] sm:$0xff] }
0x123e   :  { %v1313_v61 = vadd.f32 %v1309_v11, %v1293_v58  ;;  %v1565_v58 = vld [vmem:[%s2751_s6 + $0x40] sm:$0xff]  ;;  %v1563_v11 = vld [vmem:[%s2751_s6 + $0x30] sm:$0xff] }
0x123f   :  { %2113 = vtanh.f32 %v1312_v60  ;;  %v1428_v28 = vrot.slane %v1312_v60, 7  ;;  %v1562_v60 = vld [vmem:[%s2751_s6 + $0x28] sm:$0xff] }
0x1240   :  { %2115 = vtanh.f32 %v1313_v61  ;;  %v1429_v29 = vrot.slane %v1313_v61, 7  ;;  %v1561_v61 = vld [vmem:[%s2751_s6 + $0x20] sm:$0xff] }
0x124c   :  { %v2114_v62 = vpop.eup %2113 }
0x124d   :  { %v2116_v14 = vpop.eup %2115  ;;  %1318 = vrot.lane.b32.xlu0 %v2114_v62, %s2157_s3  ;;  %v1560_v62 = vld [vmem:[%s2751_s6 + $0x18] sm:$0xff] }
0x124e   :  { %1320 = vrot.lane.b32.xlu1 %v2116_v14, %s2157_s3 }
0x12bf   :  { %v1319_v63 = vpop.permute.xlu0 %1318 }
0x12c0   :  { %v1321_v16 = vpop.permute.xlu1 %1320  ;;  %v1324_v18 = vmul.f32 %v2110_v49, %v1319_v63  ;;  %v1568_v49 = vld [vmem:[%s2751_s6 + $0x58] sm:$0xff]  ;;  %v1559_v63 = vld [vmem:[%s2751_s6 + $0x10] sm:$0xff] }
0x12c1   :  { %v1325_v0 = vmul.f32 %v2112_v51, %v1321_v16  ;;  %v1558_v16 = vld [vmem:[%s2751_s6 + $0x8] sm:$0xff] }
0x12c2   :  { %v1328_v1 = vrot.slane %v1324_v18, 6  ;;  %v1557_v18 = vld [vmem:[%s2751_s6] sm:$0xff]  ;;  %s2133_s6 = scalar_lea.vmem %s1659_s2, 32 }
0x12c3   :  { %v1329_v2 = vrot.slane %v1325_v0, 5  ;;  %v1693_v0 = vld [vmem:[%s2750_s5] ss:$0 sm:$0xff]  ;;  %p2134_p0 = scmp.ne.s32.totalorder %s1659_s2, %s2133_s6  ;;  %p2139_p2 = scmp.lt.s32.totalorder %s2133_s6, %s2133_s6 }
0x12c5   :  { %v1330_v3 = vsel %vm491_vm3, %v1329_v2, %v1328_v1  ;;  %p2140_p3 = por %p2139_p2, %p2138_p1 }
0x12c6   :  { %1331 = vrot.lane.b32.xlu0 %v1330_v3, %s2158_s24 }
0x12c7   :  { %p2141_p4 = pnand %p2140_p3, %p2134_p0 }
0x1338   :  { %v1332_v4 = vpop.permute.xlu0 %1331 }
0x1339   :  { %1952 = vmatmul.mubr.msk.f32.vlgmr.msra.gmra.mxu0 %vm360_vm4, %v1332_v4 }
0x133a   :  { %1997 = vmatprep.mubr.msk.f32.mxu0 %vm2156_vm2, %v2155_v10  ;;  %1966 = vmatpush3.msra.mxu0 %v1572_v42 }
0x133b   :  { %1967 = vmatprep.subr.mxu0 %v2155_v10 }
0x133c   :  { %1968 = vmatpush3.msra.mxu0 %v1571_v43 }
0x133d   :  { %1969 = vmatprep.subr.mxu0 %v2155_v10 }
0x133e   :  { %1970 = vmatpush3.msra.mxu0 %v1570_v45 }
0x133f   :  { %1971 = vmatprep.subr.mxu0 %v2155_v10 }
0x1340   :  { %1972 = vmatpush3.msra.mxu0 %v1569_v46 }
0x1341   :  { %1973 = vmatprep.subr.mxu0 %v2155_v10 }
0x1342   :  { %1974 = vmatpush3.msra.mxu0 %v1568_v49 }
0x1343   :  { %1975 = vmatprep.subr.mxu0 %v2155_v10 }
0x1344   :  { %1976 = vmatpush3.msra.mxu0 %v1567_v53 }
0x1345   :  { %1977 = vmatprep.subr.mxu0 %v2155_v10 }
0x1346   :  { %1978 = vmatpush3.msra.mxu0 %v1566_v56 }
0x1347   :  { %1979 = vmatprep.subr.mxu0 %v2155_v10 }
0x1348   :  { %1980 = vmatpush3.msra.mxu0 %v1565_v58 }
0x1349   :  { %1981 = vmatprep.subr.mxu0 %v2155_v10 }
0x134a   :  { %1982 = vmatpush3.msra.mxu0 %v1564_v59 }
0x134b   :  { %1983 = vmatprep.subr.mxu0 %v2155_v10 }
0x134c   :  { %1984 = vmatpush3.msra.mxu0 %v1563_v11 }
0x134d   :  { %1985 = vmatprep.subr.mxu0 %v2155_v10 }
0x134e   :  { %1986 = vmatpush3.msra.mxu0 %v1562_v60 }
0x134f   :  { %1987 = vmatprep.subr.mxu0 %v2155_v10 }
0x1350   :  { %1988 = vmatpush3.msra.mxu0 %v1561_v61 }
0x1351   :  { %1989 = vmatprep.subr.mxu0 %v2155_v10 }
0x1352   :  { %1990 = vmatpush3.msra.mxu0 %v1560_v62 }
0x1353   :  { %1991 = vmatprep.subr.mxu0 %v2155_v10 }
0x1354   :  { %1992 = vmatpush3.msra.mxu0 %v1559_v63 }
0x1355   :  { %1993 = vmatprep.subr.mxu0 %v2155_v10 }
0x1356   :  { %1994 = vmatpush3.msra.mxu0 %v1558_v16 }
0x1357   :  { %1995 = vmatprep.subr.mxu0 %v2155_v10 }
0x1358   :  { %1996 = vmatpush3.msra.mxu0 %v1557_v18 }
0x13f9   :  { %v1401_v5 = vpop.f32.mrf.mxu0 }
0x13fa   :  { %v1406_v6 = vrot.slane %v1401_v5, 1  ;;  %v1407_v7 = vrot.slane %v1401_v5, 2  ;;  %v1695_v5 = vld [vmem:[%s2752_s7] ss:$0 sm:$0xff] }
0x13fb   :  { %v1953_v8 = vpop.f32.mrf.mxu0 }
0x13fc   :  { %v1410_v9 = vadd.f32 %v1406_v6, %v2514_v47  ;;  %v1411_v12 = vadd.f32 %v1407_v7, %v2512_v44 }
0x13fe   :  { %2117 = vtanh.f32 %v1410_v9  ;;  %v1691_v17 = vmul.f32 -1.442695, %v1410_v9  ;;  %v1692_v19 = vmul.f32 -1.442695, %v1411_v12 }
0x13ff   :  { %2119 = vtanh.f32 %v1411_v12 }
0x1400   :  { %2121 = vpow2.f32 %v1691_v17 }
0x1401   :  { %2123 = vpow2.f32 %v1692_v19 }
0x140b   :  { %v2118_v13 = vpop.eup %2117 }
0x140c   :  { %v2120_v15 = vpop.eup %2119  ;;  %1436 = vrot.lane.b32.xlu1 %v2118_v13, %s2157_s3 }
0x140d   :  { %1438 = vrot.lane.b32.xlu0 %v2120_v15, %s2157_s3  ;;  %v2122_v20 = vpop.eup %2121 }
0x140e   :  { %v2124_v21 = vpop.eup %2123  ;;  %v1418_v22 = vadd.f32 1.0, %v2122_v20 }
0x140f   :  { %v1419_v23 = vadd.f32 1.0, %v2124_v21 }
0x1410   :  { %2125 = vrcp.f32 %v1418_v22 }
0x1411   :  { %2127 = vrcp.f32 %v1419_v23 }
0x141d   :  { %v2126_v47 = vpop.eup %2125 }
0x141e   :  { %v2128_v24 = vpop.eup %2127  ;;  %v1432_v30 = vmul.f32 %v2126_v47, %v1428_v28 }
0x141f   :  { %v1433_v31 = vmul.f32 %v2128_v24, %v1429_v29 }
0x147e   :  { %v1437_v44 = vpop.permute.xlu1 %1436 }
0x147f   :  { %v1439_v25 = vpop.permute.xlu0 %1438  ;;  %v1442_v26 = vmul.f32 %v2126_v47, %v1437_v44 }
0x1480   :  { %v1443_v27 = vmul.f32 %v2128_v24, %v1439_v25 }
0x1481   :  { %1446 = vrot.lane.b32.xlu1 %v1442_v26, %s2157_s3 }
0x1482   :  { %1448 = vrot.lane.b32.xlu0 %v1443_v27, %s2157_s3 }
0x14f3   :  { %v1447_v32 = vpop.permute.xlu1 %1446 }
0x14f4   :  { %v1449_v33 = vpop.permute.xlu0 %1448  ;;  %v1452_v34 = vadd.f32 %v1447_v32, %v1432_v30 }
0x14f5   :  { %v1453_v35 = vadd.f32 %v1449_v33, %v1433_v31 }
0x14f6   :  { %2129 = vtanh.f32 %v1452_v34 }
0x14f7   :  { %2131 = vtanh.f32 %v1453_v35 }
0x1503   :  { %v2130_v40 = vpop.eup %2129 }
0x1504   :  { %v2132_v41 = vpop.eup %2131  ;;  %1458 = vrot.lane.b32.xlu1 %v2130_v40, %s2157_s3 }
0x1505   :  { %1460 = vrot.lane.b32.xlu0 %v2132_v41, %s2157_s3 }
0x1576   :  { %v1459_v48 = vpop.permute.xlu1 %1458 }
0x1577   :  { %v1461_v50 = vpop.permute.xlu0 %1460  ;;  %v1464_v51 = vmul.f32 %v2126_v47, %v1459_v48 }
0x1578   :  { %v1465_v52 = vmul.f32 %v2128_v24, %v1461_v50 }
0x1579   :  { %v1479_v54 = vrot.slane %v1464_v51, 7 }
0x157a   :  { %v1480_v55 = vrot.slane %v1465_v52, 6 }
0x157c   :  { %v1481_v57 = vsel %vm491_vm3, %v1480_v55, %v1479_v54 }
0x157d   :  { %1482 = vrot.lane.b32.xlu1 %v1481_v57, %s2158_s24 }
0x15ef   :  { %v1483_v14 = vpop.permute.xlu1 %1482 }
0x15f0   :  { %1963 = vmatmul.mubr.msk.f32.vlgmr.msra.gmra.mxu1 %vm360_vm4, %v1483_v14 }
0x16b0   :  { %v1552_v1 = vpop.f32.mrf.mxu1 }
0x16b1   :  { %v1553_v2 = vadd.f32 %v1693_v0, %v1552_v1 }
0x16b2   :  { %v1964_v3 = vpop.f32.mrf.mxu1 }
0x16b3   :  { %v1556_v4 = vmax.f32 %v1553_v2, 0.0 }
0x16b5   :  { %1998 = vmatmul.mubr.f32.vlgmr.msra.gmra.mxu0 %v1556_v4 }
0x1775   :  { %v1646_v10 = vpop.f32.mrf.mxu0 }
0x1776   :  { %v1647_v6 = vadd.f32 %v1695_v5, %v1646_v10 }
0x1777   :  { %v1999_v7 = vpop.f32.mrf.mxu0 }
0x1778   :  { %1651 = vst.msk [vmem:[#allocation2] sm:$0x3] %vm1650_vm5, %v1647_v6 }
0x1779   :  { %2144 = shalt.err (!%p2141_p4)
}
0x177a   :  { %1661 = dma.vmem_to_hbm [thread:$0]  %s1659_s2, 32, %s2753_s8, [#allocation3]  }
0x177b   :  { %2153 = dma.done.wait [#allocation3], 32  }
0x177c   :  { %2154 = vsyncadd [#allocation3], 4294967264 }
0x177d   :  { %1665 = vsyncpa [#allocation3], 1 }

</bundles_post_ra>
